<compile_context>
chip_gen: v6e
topology: v6e:2x2x1
jax: 0.10.0
libtpu: 0.0.40
codegen_flags: <defaults>
</compile_context>

<pallas_src>
import functools

import jax
import jax.numpy as jnp
from jax.experimental import pallas as pl
from jax.experimental.pallas import tpu as pltpu


def _round_up(x, m):
    return (x + m - 1) // m * m


def _vmem_specs(n):
    return [pl.BlockSpec(memory_space=pltpu.MemorySpace.VMEM) for _ in range(n)]


# ----------------------------------------------------------------------------
# Kernel 1: conv1 (as one GEMM) + bias + ReLU + 2x2/2 max-pool
# ----------------------------------------------------------------------------
def _conv_pool_kernel(p_ref, w_ref, b_ref, o_ref):
    """p_ref: (K, 4*Mp) bf16  im2col patches, 4 pool quadrants contiguous on lanes
       w_ref: (Cout, K) bf16  conv weight, torch (Cout,Cin,kh,kw) flattened
       b_ref: (Cout, 1) f32   bias
       o_ref: (Cout, Mp) bf16 pooled activation, lane-dense and 128-padded."""
    mp = o_ref.shape[-1]
    # One long MXU stream over all 4 quadrants (review item: no 4x push/drain).
    acc = jnp.dot(w_ref[...], p_ref[...], preferred_element_type=jnp.float32)
    # Max over the 4 quadrants: 128-aligned lane slices, cheap VPU work.
    pooled = jnp.maximum(
        jnp.maximum(acc[:, 0 * mp:1 * mp], acc[:, 1 * mp:2 * mp]),
        jnp.maximum(acc[:, 2 * mp:3 * mp], acc[:, 3 * mp:4 * mp]))
    # bias / ReLU / max commute (same bias per quadrant, ReLU monotone).
    o_ref[...] = jnp.maximum(pooled + b_ref[...], 0.0).astype(o_ref.dtype)


# ----------------------------------------------------------------------------
# Kernel 2: conv2 + bias + ReLU + pool fused with fc1+ReLU -> fc2+ReLU -> fc3
# ----------------------------------------------------------------------------
def _tail_kernel(p_ref, bdw_ref, b2_ref, w3_ref, b3_ref, w4_ref, b4_ref,
                 w5_ref, b5_ref, o_ref):
    """p_ref  : (4, Hp*B, Wp*K2) bf16 conv2 patches; leading dim = pool quadrant,
                rows = (pooled row h, batch b), lanes = (pooled col w, k)
       bdw_ref: (Wp*K2, Cout2*Wp) bf16 block-diag (over w) expansion of W2^T
       b2_ref : (1, Cout2*Wp) f32     conv2 bias, replicated per (c, w) column
       w3_ref : (Hp, Cout2*Wp, 256) bf16  fc1 weight regrouped by pooled row h
       b3/w4/b4/w5/b5 : fc biases/weights (w5/b5 zero-padded to 128 cols)
       o_ref  : (B, 128) f32 padded logits (full lane tile, unmasked store)."""
    nq = p_ref.shape[0]
    nh = w3_ref.shape[0]
    bsz = o_ref.shape[0]
    bdw = bdw_ref[...]

    # conv2 GEMM per quadrant, elementwise max over quadrants (= 2x2 max-pool).
    conv = jnp.dot(p_ref[0], bdw, preferred_element_type=jnp.float32)
    for q in range(1, nq):
        conv = jnp.maximum(
            conv, jnp.dot(p_ref[q], bdw, preferred_element_type=jnp.float32))
    # pooled conv2 activation: rows (h, b), lanes (c, w) — already fc1-ready.
    x2 = jnp.maximum(conv + b2_ref[...], 0.0)

    # fc1 accumulated over pooled rows h (W3 rows were regrouped at init so this
    # exactly matches torch's NCHW flatten); stays entirely in VMEM/vregs.
    h1 = jnp.dot(x2[0:bsz].astype(w3_ref.dtype), w3_ref[0],
                 preferred_element_type=jnp.float32)
    for h in range(1, nh):
        h1 = h1 + jnp.dot(x2[h * bsz:(h + 1) * bsz].astype(w3_ref.dtype),
                          w3_ref[h], preferred_element_type=jnp.float32)
    h1 = jnp.maximum(h1 + b3_ref[...], 0.0)

    h2 = jnp.dot(h1.astype(w4_ref.dtype), w4_ref[...],
                 preferred_element_type=jnp.float32)
    h2 = jnp.maximum(h2 + b4_ref[...], 0.0)

    out = jnp.dot(h2.astype(w5_ref.dtype), w5_ref[...],
                  preferred_element_type=jnp.float32)
    o_ref[...] = out + b5_ref[...]


# ----------------------------------------------------------------------------
# XLA glue (jit-fused): im2col patch building, grouped by pool quadrant
# ----------------------------------------------------------------------------
def _conv1_patches(x, kh, kw, m_pad):
    """(B,Cin,H,W) -> (Cin*kh*kw, 4*m_pad) bf16; lanes = quadrant-major, then
    m = b*Hp*Wp + hp*Wp + wp, zero-padded to m_pad per quadrant."""
    B, Cin, H, W = x.shape
    Hp, Wp = (H - kh + 1) // 2, (W - kw + 1) // 2
    M = B * Hp * Wp
    K = Cin * kh * kw
    cols = []
    for a in (0, 1):
        for c in (0, 1):
            taps = [x[:, :,
                      a + i: a + i + 2 * (Hp - 1) + 1: 2,
                      c + j: c + j + 2 * (Wp - 1) + 1: 2]
                    for i in range(kh) for j in range(kw)]
            t = jnp.stack(taps, axis=2)                    # (B, Cin, kh*kw, Hp, Wp)
            t = jnp.transpose(t, (1, 2, 0, 3, 4)).reshape(K, M)
            cols.append(jnp.pad(t, ((0, 0), (0, m_pad - M))))
    return jnp.concatenate(cols, axis=1).astype(jnp.bfloat16)


def _conv2_slabs(a1, kh, kw):
    """(B,Cin,H,W) -> (4, Hp*B, Wp*K) bf16 conv2 patch slabs.
    Leading dim = pool quadrant, rows = h*B + b, lanes = w*K + k with
    k = ci*kh*kw + i*kw + j (torch weight order)."""
    B, Cin, H, W = a1.shape
    Hp, Wp = (H - kh + 1) // 2, (W - kw + 1) // 2
    K = Cin * kh * kw
    quads = []
    for a in (0, 1):
        for c in (0, 1):
            taps = [a1[:, :,
                       a + i: a + i + 2 * (Hp - 1) + 1: 2,
                       c + j: c + j + 2 * (Wp - 1) + 1: 2]
                    for i in range(kh) for j in range(kw)]
            t = jnp.stack(taps, axis=2)                    # (B, Cin, kh*kw, Hp, Wp)
            quads.append(t.reshape(B, K, Hp, Wp))
    p = jnp.stack(quads, axis=0)                           # (4, B, K, Hp, Wp)
    p = jnp.transpose(p, (0, 3, 1, 4, 2))                  # (4, Hp, B, Wp, K)
    return p.reshape(4, Hp * B, Wp * K).astype(jnp.bfloat16)


# ----------------------------------------------------------------------------
# Pallas call wrappers
# ----------------------------------------------------------------------------
def conv_relu_pool_call(x, wmat, bcol, kh=5, kw=5):
    """conv(5x5, valid) + bias + ReLU + maxpool(2,2) as ONE Pallas call -> NCHW."""
    B, _, H, W = x.shape
    Cout = wmat.shape[0]
    Hp, Wp = (H - kh + 1) // 2, (W - kw + 1) // 2
    M = B * Hp * Wp
    m_pad = _round_up(M, 128)                              # lane-dense, unmasked stores
    p = _conv1_patches(x, kh, kw, m_pad)                   # (K, 4*m_pad)

    out = pl.pallas_call(
        _conv_pool_kernel,
        out_shape=jax.ShapeDtypeStruct((Cout, m_pad), jnp.bfloat16),
        in_specs=_vmem_specs(3),
        out_specs=pl.BlockSpec(memory_space=pltpu.MemorySpace.VMEM),
    )(p, wmat, bcol)
    # Padded lanes hold relu(bias) != 0 -> slice them off before use.
    a = out[:, :M].reshape(Cout, B, Hp, Wp)
    return jnp.transpose(a, (1, 0, 2, 3))                  # NCHW


def conv2_mlp_call(a1, kp, kh=5, kw=5):
    """conv2+bias+ReLU+pool fused with fc1+ReLU -> fc2+ReLU -> fc3 (one call)."""
    B = a1.shape[0]
    slabs = _conv2_slabs(a1, kh, kw)                       # (4, Hp*B, Wp*K2)
    assert slabs.shape[-1] == kp["bdw"].shape[0], (slabs.shape, kp["bdw"].shape)
    assert slabs.shape[1] == kp["w3r"].shape[0] * B, (slabs.shape, kp["w3r"].shape)
    n_out = kp["w5p"].shape[1]                             # 128 (padded)

    return pl.pallas_call(
        _tail_kernel,
        out_shape=jax.ShapeDtypeStruct((B, n_out), jnp.float32),
        in_specs=_vmem_specs(9),
        out_specs=pl.BlockSpec(memory_space=pltpu.MemorySpace.VMEM),
    )(slabs, kp["bdw"], kp["b2c"], kp["w3r"], kp["b3r"],
      kp["w4m"], kp["b4r"], kp["w5p"], kp["b5p"])


# ----------------------------------------------------------------------------
# Parameters: torch-style init + one-time packing into kernel layouts
# ----------------------------------------------------------------------------
def init_params(key, num_classes=100):
    def uni(k, shape, fan_in):
        bound = 1.0 / jnp.sqrt(jnp.float32(fan_in))
        return jax.random.uniform(k, shape, jnp.float32, -bound, bound)

    ks = jax.random.split(key, 10)
    return {
        "w1": uni(ks[0], (6, 3, 5, 5), 3 * 5 * 5),
        "b1": uni(ks[1], (6,), 3 * 5 * 5),
        "w2": uni(ks[2], (16, 6, 5, 5), 6 * 5 * 5),
        "b2": uni(ks[3], (16,), 6 * 5 * 5),
        "w3": uni(ks[4], (16 * 5 * 5, 256), 16 * 5 * 5),   # fc weights as (in, out)
        "b3": uni(ks[5], (256,), 16 * 5 * 5),
        "w4": uni(ks[6], (256, 128), 256),
        "b4": uni(ks[7], (128,), 256),
        "w5": uni(ks[8], (128, num_classes), 128),
        "b5": uni(ks[9], (num_classes,), 128),
    }


def pack_params(params):
    """All weight reshapes / bf16 casts hoisted out of the forward (done once)."""
    bf16, f32 = jnp.bfloat16, jnp.float32
    w2 = params["w2"]
    cout2, cin2, kh, kw = w2.shape
    k2 = cin2 * kh * kw
    hw = params["w3"].shape[0] // cout2                    # pooled conv2 spatial (25)
    hp2 = wp2 = int(round(hw ** 0.5))

    # Block-diagonal (over pooled output column w') expansion of W2^T:
    #   bdw[w*K2 + k, c*Wp2 + w'] = W2[c, k] * (w == w')
    w2m = w2.reshape(cout2, k2)
    bdw = jnp.einsum("ck,wv->wkcv", w2m, jnp.eye(wp2, dtype=w2m.dtype))
    bdw = bdw.reshape(wp2 * k2, cout2 * wp2)

    # fc1 weight with rows regrouped so the tail kernel's per-pooled-row
    # accumulation reproduces torch's NCHW flatten:
    #   w3r[h, c*Wp2 + w, n] = w3[c*Hp2*Wp2 + h*Wp2 + w, n]
    w3r = params["w3"].reshape(cout2, hp2, wp2, -1).transpose(1, 0, 2, 3)
    w3r = w3r.reshape(hp2, cout2 * wp2, -1)

    # fc3 zero-padded to a full 128-lane tile (sliced back in the wrapper).
    n_cls = params["w5"].shape[1]
    n_pad = _round_up(n_cls, 128)
    w5p = jnp.pad(params["w5"], ((0, 0), (0, n_pad - n_cls)))
    b5p = jnp.pad(params["b5"], (0, n_pad - n_cls))

    return {
        "w1m": params["w1"].reshape(params["w1"].shape[0], -1).astype(bf16),
        "b1c": params["b1"].reshape(-1, 1).astype(f32),
        "bdw": bdw.astype(bf16),
        "b2c": jnp.repeat(params["b2"], wp2).reshape(1, -1).astype(f32),
        "w3r": w3r.astype(bf16),
        "b3r": params["b3"].reshape(1, -1).astype(f32),
        "w4m": params["w4"].astype(bf16),
        "b4r": params["b4"].reshape(1, -1).astype(f32),
        "w5p": w5p.astype(bf16),
        "b5p": b5p.reshape(1, -1).astype(f32),
    }


# ----------------------------------------------------------------------------
# LeNet forward (matches the PyTorch module: returns (logits, shape_dict))
# ----------------------------------------------------------------------------
@functools.partial(jax.jit, static_argnames=("num_classes",))
def _lenet_core(x_nchw, kp, *, num_classes):
    # conv1 -> relu1 -> pool1      (Pallas call 1)
    a1 = conv_relu_pool_call(x_nchw, kp["w1m"], kp["b1c"])
    # conv2 -> relu2 -> pool2 -> flatten -> fc1+relu -> fc2+relu -> fc3
    #                               (Pallas call 2, everything stays in VMEM)
    logits_pad = conv2_mlp_call(a1, kp)
    return logits_pad[:, :num_classes]                     # drop fc3 lane padding


def lenet_forward(x_nchw, packed_params, num_classes=100):
    B, _, H, W = x_nchw.shape
    logits = _lenet_core(x_nchw, packed_params, num_classes=num_classes)
    # Intermediate shapes (static arithmetic, identical to the torch module).
    h1, w1 = (H - 5 + 1) // 2, (W - 5 + 1) // 2
    h2, w2 = (h1 - 5 + 1) // 2, (w1 - 5 + 1) // 2
    shape_dict = {
        1: (B, 6, h1, w1),
        2: (B, 16, h2, w2),
        3: (B, 16 * h2 * w2),
        4: (B, 256),
        5: (B, 128),
        6: (B, num_classes),
    }
    return logits, shape_dict


if __name__ == "__main__":
    key = jax.random.PRNGKey(0)
    k_x, k_p = jax.random.split(key)
    # LeNet's fc1 (16*5*5) requires 32x32 spatial input; batch=2, NCHW like PyTorch.
    x = jax.random.normal(k_x, (2, 3, 32, 32), jnp.float32)
    params = init_params(k_p, num_classes=100)
    packed = pack_params(params)

    logits, shape_dict = lenet_forward(x, packed, num_classes=100)
    logits = jax.block_until_ready(logits)

    assert logits.shape == (2, 100), logits.shape
    assert bool(jnp.all(jnp.isfinite(logits)))
    assert shape_dict[1] == (2, 6, 14, 14)
    assert shape_dict[2] == (2, 16, 5, 5)
    assert shape_dict[3] == (2, 400)
    assert shape_dict[4] == (2, 256)
    assert shape_dict[5] == (2, 128)
    assert shape_dict[6] == (2, 100)
    print("KERNEL_OK")
</pallas_src>

<mosaic_0001>
module attributes {stable_mosaic.version = 11 : i64} {
  func.func @_conv_pool_kernel(%arg0: memref<75x2048xbf16, #tpu.memory_space<vmem>>, %arg1: memref<6x75xbf16, #tpu.memory_space<vmem>>, %arg2: memref<6x1xf32, #tpu.memory_space<vmem>>, %arg3: memref<6x512xbf16, #tpu.memory_space<vmem>>) attributes {dimension_semantics = [], scalar_prefetch = 0 : i64, scratch_operands = 0 : i64, tpu.core_type = #tpu.core_type<tc>} {
    %c0 = arith.constant 0 : index
    %c0_0 = arith.constant 0 : index
    %0 = vector.load %arg1[%c0, %c0_0] : memref<6x75xbf16, #tpu.memory_space<vmem>>, vector<6x75xbf16>
    %c0_1 = arith.constant 0 : index
    %c0_2 = arith.constant 0 : index
    %1 = vector.load %arg0[%c0_1, %c0_2] : memref<75x2048xbf16, #tpu.memory_space<vmem>>, vector<75x2048xbf16>
    %cst = arith.constant dense<0.000000e+00> : vector<6x2048xf32>
    %2 = tpu.matmul %0, %1, %cst {dimension_numbers = #tpu.dot_dimension_numbers<[1], [0], [0], [1], [0, 0, 1, 1], [], []>} : vector<6x75xbf16>, vector<75x2048xbf16>, vector<6x2048xf32> -> vector<6x2048xf32>
    %3 = vector.extract_strided_slice %2 {offsets = [0, 0], sizes = [6, 512], strides = [1, 1]} : vector<6x2048xf32> to vector<6x512xf32>
    %4 = vector.extract_strided_slice %2 {offsets = [0, 512], sizes = [6, 512], strides = [1, 1]} : vector<6x2048xf32> to vector<6x512xf32>
    %5 = arith.maximumf %3, %4 : vector<6x512xf32>
    %6 = vector.extract_strided_slice %2 {offsets = [0, 1024], sizes = [6, 512], strides = [1, 1]} : vector<6x2048xf32> to vector<6x512xf32>
    %7 = vector.extract_strided_slice %2 {offsets = [0, 1536], sizes = [6, 512], strides = [1, 1]} : vector<6x2048xf32> to vector<6x512xf32>
    %8 = arith.maximumf %6, %7 : vector<6x512xf32>
    %9 = arith.maximumf %5, %8 : vector<6x512xf32>
    %c0_3 = arith.constant 0 : index
    %c0_4 = arith.constant 0 : index
    %10 = vector.load %arg2[%c0_3, %c0_4] : memref<6x1xf32, #tpu.memory_space<vmem>>, vector<6x1xf32>
    %11 = vector.broadcast %10 : vector<6x1xf32> to vector<6x512xf32>
    %12 = arith.addf %9, %11 : vector<6x512xf32>
    %cst_5 = arith.constant 0.000000e+00 : f32
    %13 = vector.broadcast %cst_5 : f32 to vector<6x512xf32>
    %14 = arith.maximumf %12, %13 : vector<6x512xf32>
    %15 = arith.truncf %14 : vector<6x512xf32> to vector<6x512xbf16>
    %c0_6 = arith.constant 0 : index
    %c0_7 = arith.constant 0 : index
    %16 = vector.load %arg3[%c0_6, %c0_7] : memref<6x512xbf16, #tpu.memory_space<vmem>>, vector<6x512xbf16>
    tpu.vector_store %arg3[%c0_6, %c0_7], %15 {strides = array<i32>} : memref<6x512xbf16, #tpu.memory_space<vmem>>, vector<6x512xbf16>,
    return
  }
}

module attributes {stable_mosaic.version = 11 : i64} {
  func.func @_tail_kernel(%arg0: memref<4x10x750xbf16, #tpu.memory_space<vmem>>, %arg1: memref<750x80xbf16, #tpu.memory_space<vmem>>, %arg2: memref<1x80xf32, #tpu.memory_space<vmem>>, %arg3: memref<5x80x256xbf16, #tpu.memory_space<vmem>>, %arg4: memref<1x256xf32, #tpu.memory_space<vmem>>, %arg5: memref<256x128xbf16, #tpu.memory_space<vmem>>, %arg6: memref<1x128xf32, #tpu.memory_space<vmem>>, %arg7: memref<128x128xbf16, #tpu.memory_space<vmem>>, %arg8: memref<1x128xf32, #tpu.memory_space<vmem>>, %arg9: memref<2x128xf32, #tpu.memory_space<vmem>>) attributes {dimension_semantics = [], scalar_prefetch = 0 : i64, scratch_operands = 0 : i64, tpu.core_type = #tpu.core_type<tc>} {
    %c0 = arith.constant 0 : index
    %c0_0 = arith.constant 0 : index
    %0 = vector.load %arg1[%c0, %c0_0] : memref<750x80xbf16, #tpu.memory_space<vmem>>, vector<750x80xbf16>
    %c0_1 = arith.constant 0 : index
    %c0_2 = arith.constant 0 : index
    %c0_3 = arith.constant 0 : index
    %1 = vector.load %arg0[%c0_1, %c0_2, %c0_3] : memref<4x10x750xbf16, #tpu.memory_space<vmem>>, vector<1x10x750xbf16>
    %2 = vector.shape_cast %1 : vector<1x10x750xbf16> to vector<10x750xbf16>
    %cst = arith.constant dense<0.000000e+00> : vector<10x80xf32>
    %3 = tpu.matmul %2, %0, %cst {dimension_numbers = #tpu.dot_dimension_numbers<[1], [0], [0], [1], [0, 0, 1, 1], [], []>} : vector<10x750xbf16>, vector<750x80xbf16>, vector<10x80xf32> -> vector<10x80xf32>
    %c1 = arith.constant 1 : index
    %c0_4 = arith.constant 0 : index
    %c0_5 = arith.constant 0 : index
    %4 = vector.load %arg0[%c1, %c0_4, %c0_5] : memref<4x10x750xbf16, #tpu.memory_space<vmem>>, vector<1x10x750xbf16>
    %5 = vector.shape_cast %4 : vector<1x10x750xbf16> to vector<10x750xbf16>
    %cst_6 = arith.constant dense<0.000000e+00> : vector<10x80xf32>
    %6 = tpu.matmul %5, %0, %cst_6 {dimension_numbers = #tpu.dot_dimension_numbers<[1], [0], [0], [1], [0, 0, 1, 1], [], []>} : vector<10x750xbf16>, vector<750x80xbf16>, vector<10x80xf32> -> vector<10x80xf32>
    %7 = arith.maximumf %3, %6 : vector<10x80xf32>
    %c2 = arith.constant 2 : index
    %c0_7 = arith.constant 0 : index
    %c0_8 = arith.constant 0 : index
    %8 = vector.load %arg0[%c2, %c0_7, %c0_8] : memref<4x10x750xbf16, #tpu.memory_space<vmem>>, vector<1x10x750xbf16>
    %9 = vector.shape_cast %8 : vector<1x10x750xbf16> to vector<10x750xbf16>
    %cst_9 = arith.constant dense<0.000000e+00> : vector<10x80xf32>
    %10 = tpu.matmul %9, %0, %cst_9 {dimension_numbers = #tpu.dot_dimension_numbers<[1], [0], [0], [1], [0, 0, 1, 1], [], []>} : vector<10x750xbf16>, vector<750x80xbf16>, vector<10x80xf32> -> vector<10x80xf32>
    %11 = arith.maximumf %7, %10 : vector<10x80xf32>
    %c3 = arith.constant 3 : index
    %c0_10 = arith.constant 0 : index
    %c0_11 = arith.constant 0 : index
    %12 = vector.load %arg0[%c3, %c0_10, %c0_11] : memref<4x10x750xbf16, #tpu.memory_space<vmem>>, vector<1x10x750xbf16>
    %13 = vector.shape_cast %12 : vector<1x10x750xbf16> to vector<10x750xbf16>
    %cst_12 = arith.constant dense<0.000000e+00> : vector<10x80xf32>
    %14 = tpu.matmul %13, %0, %cst_12 {dimension_numbers = #tpu.dot_dimension_numbers<[1], [0], [0], [1], [0, 0, 1, 1], [], []>} : vector<10x750xbf16>, vector<750x80xbf16>, vector<10x80xf32> -> vector<10x80xf32>
    %15 = arith.maximumf %11, %14 : vector<10x80xf32>
    %c0_13 = arith.constant 0 : index
    %c0_14 = arith.constant 0 : index
    %16 = vector.load %arg2[%c0_13, %c0_14] : memref<1x80xf32, #tpu.memory_space<vmem>>, vector<1x80xf32>
    %17 = vector.broadcast %16 : vector<1x80xf32> to vector<10x80xf32>
    %18 = arith.addf %15, %17 : vector<10x80xf32>
    %cst_15 = arith.constant 0.000000e+00 : f32
    %19 = vector.broadcast %cst_15 : f32 to vector<10x80xf32>
    %20 = arith.maximumf %18, %19 : vector<10x80xf32>
    %21 = vector.extract_strided_slice %20 {offsets = [0, 0], sizes = [2, 80], strides = [1, 1]} : vector<10x80xf32> to vector<2x80xf32>
    %22 = arith.truncf %21 : vector<2x80xf32> to vector<2x80xbf16>
    %c0_16 = arith.constant 0 : index
    %c0_17 = arith.constant 0 : index
    %c0_18 = arith.constant 0 : index
    %23 = vector.load %arg3[%c0_16, %c0_17, %c0_18] : memref<5x80x256xbf16, #tpu.memory_space<vmem>>, vector<1x80x256xbf16>
    %24 = vector.shape_cast %23 : vector<1x80x256xbf16> to vector<80x256xbf16>
    %cst_19 = arith.constant dense<0.000000e+00> : vector<2x256xf32>
    %25 = tpu.matmul %22, %24, %cst_19 {dimension_numbers = #tpu.dot_dimension_numbers<[1], [0], [0], [1], [0, 0, 1, 1], [], []>} : vector<2x80xbf16>, vector<80x256xbf16>, vector<2x256xf32> -> vector<2x256xf32>
    %26 = vector.extract_strided_slice %20 {offsets = [2, 0], sizes = [2, 80], strides = [1, 1]} : vector<10x80xf32> to vector<2x80xf32>
    %27 = arith.truncf %26 : vector<2x80xf32> to vector<2x80xbf16>
    %c1_20 = arith.constant 1 : index
    %c0_21 = arith.constant 0 : index
    %c0_22 = arith.constant 0 : index
    %28 = vector.load %arg3[%c1_20, %c0_21, %c0_22] : memref<5x80x256xbf16, #tpu.memory_space<vmem>>, vector<1x80x256xbf16>
    %29 = vector.shape_cast %28 : vector<1x80x256xbf16> to vector<80x256xbf16>
    %cst_23 = arith.constant dense<0.000000e+00> : vector<2x256xf32>
    %30 = tpu.matmul %27, %29, %cst_23 {dimension_numbers = #tpu.dot_dimension_numbers<[1], [0], [0], [1], [0, 0, 1, 1], [], []>} : vector<2x80xbf16>, vector<80x256xbf16>, vector<2x256xf32> -> vector<2x256xf32>
    %31 = arith.addf %25, %30 : vector<2x256xf32>
    %32 = vector.extract_strided_slice %20 {offsets = [4, 0], sizes = [2, 80], strides = [1, 1]} : vector<10x80xf32> to vector<2x80xf32>
    %33 = arith.truncf %32 : vector<2x80xf32> to vector<2x80xbf16>
    %c2_24 = arith.constant 2 : index
    %c0_25 = arith.constant 0 : index
    %c0_26 = arith.constant 0 : index
    %34 = vector.load %arg3[%c2_24, %c0_25, %c0_26] : memref<5x80x256xbf16, #tpu.memory_space<vmem>>, vector<1x80x256xbf16>
    %35 = vector.shape_cast %34 : vector<1x80x256xbf16> to vector<80x256xbf16>
    %cst_27 = arith.constant dense<0.000000e+00> : vector<2x256xf32>
    %36 = tpu.matmul %33, %35, %cst_27 {dimension_numbers = #tpu.dot_dimension_numbers<[1], [0], [0], [1], [0, 0, 1, 1], [], []>} : vector<2x80xbf16>, vector<80x256xbf16>, vector<2x256xf32> -> vector<2x256xf32>
    %37 = arith.addf %31, %36 : vector<2x256xf32>
    %38 = vector.extract_strided_slice %20 {offsets = [6, 0], sizes = [2, 80], strides = [1, 1]} : vector<10x80xf32> to vector<2x80xf32>
    %39 = arith.truncf %38 : vector<2x80xf32> to vector<2x80xbf16>
    %c3_28 = arith.constant 3 : index
    %c0_29 = arith.constant 0 : index
    %c0_30 = arith.constant 0 : index
    %40 = vector.load %arg3[%c3_28, %c0_29, %c0_30] : memref<5x80x256xbf16, #tpu.memory_space<vmem>>, vector<1x80x256xbf16>
    %41 = vector.shape_cast %40 : vector<1x80x256xbf16> to vector<80x256xbf16>
    %cst_31 = arith.constant dense<0.000000e+00> : vector<2x256xf32>
    %42 = tpu.matmul %39, %41, %cst_31 {dimension_numbers = #tpu.dot_dimension_numbers<[1], [0], [0], [1], [0, 0, 1, 1], [], []>} : vector<2x80xbf16>, vector<80x256xbf16>, vector<2x256xf32> -> vector<2x256xf32>
    %43 = arith.addf %37, %42 : vector<2x256xf32>
    %44 = vector.extract_strided_slice %20 {offsets = [8, 0], sizes = [2, 80], strides = [1, 1]} : vector<10x80xf32> to vector<2x80xf32>
    %45 = arith.truncf %44 : vector<2x80xf32> to vector<2x80xbf16>
    %c4 = arith.constant 4 : index
    %c0_32 = arith.constant 0 : index
    %c0_33 = arith.constant 0 : index
    %46 = vector.load %arg3[%c4, %c0_32, %c0_33] : memref<5x80x256xbf16, #tpu.memory_space<vmem>>, vector<1x80x256xbf16>
    %47 = vector.shape_cast %46 : vector<1x80x256xbf16> to vector<80x256xbf16>
    %cst_34 = arith.constant dense<0.000000e+00> : vector<2x256xf32>
    %48 = tpu.matmul %45, %47, %cst_34 {dimension_numbers = #tpu.dot_dimension_numbers<[1], [0], [0], [1], [0, 0, 1, 1], [], []>} : vector<2x80xbf16>, vector<80x256xbf16>, vector<2x256xf32> -> vector<2x256xf32>
    %49 = arith.addf %43, %48 : vector<2x256xf32>
    %c0_35 = arith.constant 0 : index
    %c0_36 = arith.constant 0 : index
    %50 = vector.load %arg4[%c0_35, %c0_36] : memref<1x256xf32, #tpu.memory_space<vmem>>, vector<1x256xf32>
    %51 = vector.broadcast %50 : vector<1x256xf32> to vector<2x256xf32>
    %52 = arith.addf %49, %51 : vector<2x256xf32>
    %cst_37 = arith.constant 0.000000e+00 : f32
    %53 = vector.broadcast %cst_37 : f32 to vector<2x256xf32>
    %54 = arith.maximumf %52, %53 : vector<2x256xf32>
    %55 = arith.truncf %54 : vector<2x256xf32> to vector<2x256xbf16>
    %c0_38 = arith.constant 0 : index
    %c0_39 = arith.constant 0 : index
    %56 = vector.load %arg5[%c0_38, %c0_39] : memref<256x128xbf16, #tpu.memory_space<vmem>>, vector<256x128xbf16>
    %cst_40 = arith.constant dense<0.000000e+00> : vector<2x128xf32>
    %57 = tpu.matmul %55, %56, %cst_40 {dimension_numbers = #tpu.dot_dimension_numbers<[1], [0], [0], [1], [0, 0, 1, 1], [], []>} : vector<2x256xbf16>, vector<256x128xbf16>, vector<2x128xf32> -> vector<2x128xf32>
    %c0_41 = arith.constant 0 : index
    %c0_42 = arith.constant 0 : index
    %58 = vector.load %arg6[%c0_41, %c0_42] : memref<1x128xf32, #tpu.memory_space<vmem>>, vector<1x128xf32>
    %59 = vector.broadcast %58 : vector<1x128xf32> to vector<2x128xf32>
    %60 = arith.addf %57, %59 : vector<2x128xf32>
    %cst_43 = arith.constant 0.000000e+00 : f32
    %61 = vector.broadcast %cst_43 : f32 to vector<2x128xf32>
    %62 = arith.maximumf %60, %61 : vector<2x128xf32>
    %63 = arith.truncf %62 : vector<2x128xf32> to vector<2x128xbf16>
    %c0_44 = arith.constant 0 : index
    %c0_45 = arith.constant 0 : index
    %64 = vector.load %arg7[%c0_44, %c0_45] : memref<128x128xbf16, #tpu.memory_space<vmem>>, vector<128x128xbf16>
    %cst_46 = arith.constant dense<0.000000e+00> : vector<2x128xf32>
    %65 = tpu.matmul %63, %64, %cst_46 {dimension_numbers = #tpu.dot_dimension_numbers<[1], [0], [0], [1], [0, 0, 1, 1], [], []>} : vector<2x128xbf16>, vector<128x128xbf16>, vector<2x128xf32> -> vector<2x128xf32>
    %c0_47 = arith.constant 0 : index
    %c0_48 = arith.constant 0 : index
    %66 = vector.load %arg8[%c0_47, %c0_48] : memref<1x128xf32, #tpu.memory_space<vmem>>, vector<1x128xf32>
    %67 = vector.broadcast %66 : vector<1x128xf32> to vector<2x128xf32>
    %68 = arith.addf %65, %67 : vector<2x128xf32>
    %c0_49 = arith.constant 0 : index
    %c0_50 = arith.constant 0 : index
    %69 = vector.load %arg9[%c0_49, %c0_50] : memref<2x128xf32, #tpu.memory_space<vmem>>, vector<2x128xf32>
    tpu.vector_store %arg9[%c0_49, %c0_50], %68 {strides = array<i32>} : memref<2x128xf32, #tpu.memory_space<vmem>>, vector<2x128xf32>,
    return
  }
}

</mosaic_0001>

<bundles_post_ra>
// kernel: _lenet_core.2
= control target key start
LH: loop header
LB: loop body
LE: loop exit
PB: predicated region body
PF: predicated region fallthrough
CT: control target
= control target key end

     0   :  { %vm484_vm0 = vcmask 1044480   ;;  %vm485_vm1 = vcmask 1045504   ;;  %v1007_v2 = vmov 65535   ;;  %v1008_v5 = vmov 0   ;;  %s1326_s0 = inlined_call_operand.vmem [shape: bf16[75,2048], index: 0, kind: input, shape index: {}]   ;;  %s1327_s1 = inlined_call_operand.vmem [shape: bf16[6,75], index: 1, kind: input, shape index: {}]   ;;  %s1328_s2 = inlined_call_operand.vmem [shape: f32[6,1], index: 2, kind: input, shape index: {}]   ;;  %s1329_s3 = inlined_call_operand.vmem [shape: bf16[6,512], index: 3, kind: output, shape index: {}]  }
   0x1   :  { %v80_v0 = vld [vmem:[%s1326_s0 + $0x200] sm:$0xff]  ;;  %v486_v3 = vsel %vm484_vm0, 4294967295, %v1007_v2  ;;  %v81_v4 = vld [vmem:[%s1326_s0 + $0x208] sm:$0xff]  ;;  %568 = vmatprep.mubr.bf16.mxu0 %v1008_v5  ;;  %609 = vmatprep.mubr.bf16.mxu1 %v1008_v5  ;;  %v82_v41 = vld [vmem:[%s1326_s0 + $0x210] sm:$0xff]  ;;  %vm480_vm2 = vcmask 613376  }
   0x2   :  { %v88_v1 = vld [vmem:[%s1326_s0 + $0x240] sm:$0x33]  ;;  %v1040_v7 = vsel %vm485_vm1, %v486_v3, 0  ;;  %v89_v8 = vld [vmem:[%s1326_s0 + $0x248] sm:$0x33]  ;;  %1006 = vset.pattern.permute.xlu0 %v1008_v5  ;;  %v83_v44 = vld [vmem:[%s1326_s0 + $0x218] sm:$0xff] }
   0x3   :  { %v977_v6 = vcombine.high %v80_v0, %v88_v1  ;;  %v976_v9 = vcombine.low %v80_v0, %v88_v1  ;;  %v64_v10 = vld [vmem:[%s1326_s0 + $0x180] sm:$0xff]  ;;  %v979_v12 = vcombine.high %v81_v4, %v89_v8  ;;  %v978_v13 = vcombine.low %v81_v4, %v89_v8  ;;  %v65_v14 = vld [vmem:[%s1326_s0 + $0x188] sm:$0xff]  ;;  %v90_v42 = vld [vmem:[%s1326_s0 + $0x250] sm:$0x33] }
   0x4   :  { %v72_v11 = vld [vmem:[%s1326_s0 + $0x1c0] sm:$0xff]  ;;  %v73_v15 = vld [vmem:[%s1326_s0 + $0x1c8] sm:$0xff]  ;;  %v91_v45 = vld [vmem:[%s1326_s0 + $0x258] sm:$0x33]  ;;  %v981_v49 = vcombine.high %v82_v41, %v90_v42  ;;  %v980_v53 = vcombine.low %v82_v41, %v90_v42 }
   0x5   :  { %v492_v16 = vand.u32 %v977_v6, %v1040_v7  ;;  %v489_v17 = vand.u32 %v976_v9, %v1040_v7  ;;  %v961_v18 = vcombine.high %v64_v10, %v72_v11  ;;  %v498_v19 = vand.u32 %v979_v12, %v1040_v7  ;;  %v48_v22 = vld [vmem:[%s1326_s0 + $0x100] sm:$0xff]  ;;  %v49_v24 = vld [vmem:[%s1326_s0 + $0x108] sm:$0xff]  ;;  %v66_v58 = vld [vmem:[%s1326_s0 + $0x190] sm:$0xff] }
   0x6   :  { %v495_v20 = vand.u32 %v978_v13, %v1040_v7  ;;  %v963_v21 = vcombine.high %v65_v14, %v73_v15  ;;  %v56_v23 = vld [vmem:[%s1326_s0 + $0x140] sm:$0xff]  ;;  %v57_v25 = vld [vmem:[%s1326_s0 + $0x148] sm:$0xff]  ;;  %v960_v26 = vcombine.low %v64_v10, %v72_v11  ;;  %v962_v27 = vcombine.low %v65_v14, %v73_v15  ;;  %v74_v59 = vld [vmem:[%s1326_s0 + $0x1d0] sm:$0xff] }
   0x7   :  { %542 = vmatprep.subr.bf16.mxu0 %v492_v16  ;;  %583 = vmatprep.subr.bf16.mxu1 %v498_v19  ;;  %v945_v28 = vcombine.high %v48_v22, %v56_v23  ;;  %v947_v29 = vcombine.high %v49_v24, %v57_v25  ;;  %v32_v30 = vld [vmem:[%s1326_s0 + $0x80] sm:$0xff]  ;;  %v33_v32 = vld [vmem:[%s1326_s0 + $0x88] sm:$0xff]  ;;  %v944_v34 = vcombine.low %v48_v22, %v56_v23  ;;  %v67_v60 = vld [vmem:[%s1326_s0 + $0x198] sm:$0xff] }
   0x8   :  { %543 = vmatpush1.bf16.msra.mxu0 %v489_v17  ;;  %584 = vmatpush1.bf16.msra.mxu1 %v495_v20  ;;  %v40_v31 = vld [vmem:[%s1326_s0 + $0xc0] sm:$0xff]  ;;  %v41_v33 = vld [vmem:[%s1326_s0 + $0xc8] sm:$0xff]  ;;  %v946_v35 = vcombine.low %v49_v24, %v57_v25  ;;  %v983_v51 = vcombine.high %v83_v44, %v91_v45  ;;  %v504_v55 = vand.u32 %v981_v49, %v1040_v7  ;;  %v75_v61 = vld [vmem:[%s1326_s0 + $0x1d8] sm:$0xff] }
   0x9   :  { %544 = vmatprep.subr.bf16.mxu0 %v961_v18  ;;  %585 = vmatprep.subr.bf16.mxu1 %v963_v21  ;;  %v929_v36 = vcombine.high %v32_v30, %v40_v31  ;;  %v16_v37 = vld [vmem:[%s1326_s0] sm:$0xff]  ;;  %v931_v39 = vcombine.high %v33_v32, %v41_v33  ;;  %v17_v40 = vld [vmem:[%s1326_s0 + $0x8] sm:$0xff]  ;;  %v928_v46 = vcombine.low %v32_v30, %v40_v31  ;;  %v50_v3 = vld [vmem:[%s1326_s0 + $0x110] sm:$0xff] }
   0xa   :  { %v24_v38 = vld [vmem:[%s1326_s0 + $0x40] sm:$0xff]  ;;  %v25_v43 = vld [vmem:[%s1326_s0 + $0x48] sm:$0xff]  ;;  %v930_v47 = vcombine.low %v33_v32, %v41_v33  ;;  %v982_v56 = vcombine.low %v83_v44, %v91_v45  ;;  %v510_v57 = vand.u32 %v983_v51, %v1040_v7  ;;  %v501_v63 = vand.u32 %v980_v53, %v1040_v7  ;;  %v58_v4 = vld [vmem:[%s1326_s0 + $0x150] sm:$0xff] }
   0xb   :  { %v913_v48 = vcombine.high %v16_v37, %v24_v38  ;;  %v915_v50 = vcombine.high %v17_v40, %v25_v43  ;;  %v912_v52 = vcombine.low %v16_v37, %v24_v38  ;;  %v914_v54 = vcombine.low %v17_v40, %v25_v43  ;;  %v1127_v62 = vld [vmem:[%s1327_s1] sm:$0x7]  ;;  %v51_v6 = vld [vmem:[%s1326_s0 + $0x118] sm:$0xff]  ;;  %v34_v14 = vld [vmem:[%s1326_s0 + $0x90] sm:$0xff] }
   0xc   :  { %545 = vmatpush1.bf16.msra.mxu0 %v960_v26  ;;  %586 = vmatpush1.bf16.msra.mxu1 %v962_v27  ;;  %v507_v0 = vand.u32 %v982_v56, %v1040_v7  ;;  %v965_v1 = vcombine.high %v66_v58, %v74_v59  ;;  %v967_v2 = vcombine.high %v67_v60, %v75_v61  ;;  %v59_v8 = vld [vmem:[%s1326_s0 + $0x158] sm:$0xff]  ;;  %v876_v12 = vld [vmem:[%s1328_s2] sm:$0x3f]  ;;  %v42_v15 = vld [vmem:[%s1326_s0 + $0xd0] sm:$0xff] }
   0xd   :  { %546 = vmatprep.subr.bf16.mxu0 %v945_v28  ;;  %587 = vmatprep.subr.bf16.mxu1 %v947_v29  ;;  %v964_v9 = vcombine.low %v66_v58, %v74_v59  ;;  %v966_v10 = vcombine.low %v67_v60, %v75_v61  ;;  %v949_v11 = vcombine.high %v50_v3, %v58_v4  ;;  %v35_v16 = vld [vmem:[%s1326_s0 + $0x98] sm:$0xff]  ;;  %v18_v21 = vld [vmem:[%s1326_s0 + $0x10] sm:$0xff]  ;;  %v84_v25 = vld [vmem:[%s1326_s0 + $0x220] sm:$0xff] }
   0xe   :  { %v951_v13 = vcombine.high %v51_v6, %v59_v8  ;;  %v43_v17 = vld [vmem:[%s1326_s0 + $0xd8] sm:$0xff]  ;;  %879 = vperm.xlu0 %1006, %v876_v12   ;;  %v948_v18 = vcombine.low %v50_v3, %v58_v4  ;;  %v950_v19 = vcombine.low %v51_v6, %v59_v8  ;;  %v933_v20 = vcombine.high %v34_v14, %v42_v15  ;;  %v26_v22 = vld [vmem:[%s1326_s0 + $0x50] sm:$0xff]  ;;  %v92_v26 = vld [vmem:[%s1326_s0 + $0x260] sm:$0x33] }
   0xf   :  { %v935_v23 = vcombine.high %v35_v16, %v43_v17  ;;  %v19_v24 = vld [vmem:[%s1326_s0 + $0x18] sm:$0xff]  ;;  %v85_v28 = vld [vmem:[%s1326_s0 + $0x228] sm:$0xff]  ;;  %v932_v30 = vcombine.low %v34_v14, %v42_v15  ;;  %v934_v31 = vcombine.low %v35_v16, %v43_v17  ;;  %v917_v32 = vcombine.high %v18_v21, %v26_v22  ;;  %v68_v42 = vld [vmem:[%s1326_s0 + $0x1a0] sm:$0xff] }
  0x10   :  { %547 = vmatpush1.bf16.msra.mxu0 %v944_v34  ;;  %588 = vmatpush1.bf16.msra.mxu1 %v946_v35  ;;  %v27_v27 = vld [vmem:[%s1326_s0 + $0x58] sm:$0xff]  ;;  %v93_v29 = vld [vmem:[%s1326_s0 + $0x268] sm:$0x33]  ;;  %v985_v33 = vcombine.high %v84_v25, %v92_v26  ;;  %v984_v37 = vcombine.low %v84_v25, %v92_v26  ;;  %v76_v43 = vld [vmem:[%s1326_s0 + $0x1e0] sm:$0xff] }
  0x11   :  { %548 = vmatprep.subr.bf16.mxu0 %v929_v36  ;;  %589 = vmatprep.subr.bf16.mxu1 %v931_v39  ;;  %v919_v34 = vcombine.high %v19_v24, %v27_v27  ;;  %v987_v35 = vcombine.high %v85_v28, %v93_v29  ;;  %v916_v36 = vcombine.low %v18_v21, %v26_v22  ;;  %v69_v44 = vld [vmem:[%s1326_s0 + $0x1a8] sm:$0xff]  ;;  %v60_v51 = vld [vmem:[%s1326_s0 + $0x160] sm:$0xff]  ;;  %v86_v8 = vld [vmem:[%s1326_s0 + $0x230] sm:$0xff] }
  0x12   :  { %v918_v38 = vcombine.low %v19_v24, %v27_v27  ;;  %v516_v39 = vand.u32 %v985_v33, %v1040_v7  ;;  %v986_v40 = vcombine.low %v85_v28, %v93_v29  ;;  %v77_v45 = vld [vmem:[%s1326_s0 + $0x1e8] sm:$0xff]  ;;  %v36_v58 = vld [vmem:[%s1326_s0 + $0xa0] sm:$0xff]  ;;  %v95_v12 = vld [vmem:[%s1326_s0 + $0x278] sm:$0x33] }
  0x13   :  { %v522_v41 = vand.u32 %v987_v35, %v1040_v7  ;;  %v971_v49 = vcombine.high %v69_v44, %v77_v45  ;;  %v61_v53 = vld [vmem:[%s1326_s0 + $0x168] sm:$0xff]  ;;  %v44_v59 = vld [vmem:[%s1326_s0 + $0xe0] sm:$0xff]  ;;  %v70_v25 = vld [vmem:[%s1326_s0 + $0x1b0] sm:$0xff] }
  0x14   :  { %549 = vmatpush1.bf16.msra.mxu0 %v928_v46  ;;  %590 = vmatpush1.bf16.msra.mxu1 %v930_v47  ;;  %v513_v46 = vand.u32 %v984_v37, %v1040_v7  ;;  %v519_v47 = vand.u32 %v986_v40, %v1040_v7  ;;  %v37_v60 = vld [vmem:[%s1326_s0 + $0xa8] sm:$0xff]  ;;  %v28_v3 = vld [vmem:[%s1326_s0 + $0x60] sm:$0xff]  ;;  %v78_v26 = vld [vmem:[%s1326_s0 + $0x1f0] sm:$0xff] }
  0x15   :  { %550 = vmatprep.subr.bf16.mxu0 %v913_v48  ;;  %591 = vmatprep.subr.bf16.mxu1 %v915_v50  ;;  %v969_v48 = vcombine.high %v68_v42, %v76_v43  ;;  %v52_v50 = vld [vmem:[%s1326_s0 + $0x120] sm:$0xff]  ;;  %v45_v61 = vld [vmem:[%s1326_s0 + $0xe8] sm:$0xff]  ;;  %v71_v27 = vld [vmem:[%s1326_s0 + $0x1b8] sm:$0xff] }
  0x16   :  { %v953_v56 = vcombine.high %v52_v50, %v60_v51  ;;  %v939_v4 = vcombine.high %v37_v60, %v45_v61  ;;  %v21_v6 = vld [vmem:[%s1326_s0 + $0x28] sm:$0xff]  ;;  %v938_v14 = vcombine.low %v37_v60, %v45_v61  ;;  %v79_v28 = vld [vmem:[%s1326_s0 + $0x1f8] sm:$0xff]  ;;  %v54_v33 = vld [vmem:[%s1326_s0 + $0x130] sm:$0xff] }
  0x17   :  { %v55_v35 = vld [vmem:[%s1326_s0 + $0x138] sm:$0xff]  ;;  %v974_v37 = vcombine.low %v71_v27, %v79_v28  ;;  %v38_v40 = vld [vmem:[%s1326_s0 + $0xb0] sm:$0xff] }
  0x18   :  { %551 = vmatpush1.bf16.msra.mxu0 %v912_v52  ;;  %592 = vmatpush1.bf16.msra.mxu1 %v914_v54  ;;  %v53_v52 = vld [vmem:[%s1326_s0 + $0x128] sm:$0xff]  ;;  %v968_v54 = vcombine.low %v68_v42, %v76_v43  ;;  %v39_v42 = vld [vmem:[%s1326_s0 + $0xb8] sm:$0xff] }
  0x19   :  { %624 = vmatprep.subr.bf16.mxu0 %v504_v55  ;;  %665 = vmatprep.subr.bf16.mxu1 %v510_v57  ;;  %v970_v55 = vcombine.low %v69_v44, %v77_v45  ;;  %v955_v57 = vcombine.high %v53_v52, %v61_v53  ;;  %v47_v43 = vld [vmem:[%s1326_s0 + $0xf8] sm:$0xff] }
  0x1b   :  { %992 = vmatmul.mubr.msk.bf16.vlgmr.msra.gmra.mxu0 %vm480_vm2, %v1127_v62  ;;  %993 = vmatmul.mubr.msk.bf16.vlgmr.msra.gmra.mxu1 %vm480_vm2, %v1127_v62 }
  0x1c   :  { %625 = vmatpush1.bf16.msra.mxu0 %v501_v63  ;;  %666 = vmatpush1.bf16.msra.mxu1 %v507_v0  ;;  %v952_v63 = vcombine.low %v52_v50, %v60_v51  ;;  %v954_v0 = vcombine.low %v53_v52, %v61_v53  ;;  %v31_v50 = vld [vmem:[%s1326_s0 + $0x78] sm:$0xff]  ;;  %v942_v52 = vcombine.low %v39_v42, %v47_v43 }
  0x1d   :  { %626 = vmatprep.subr.bf16.mxu0 %v965_v1  ;;  %667 = vmatprep.subr.bf16.mxu1 %v967_v2  ;;  %v937_v1 = vcombine.high %v36_v58, %v44_v59  ;;  %v20_v2 = vld [vmem:[%s1326_s0 + $0x20] sm:$0xff] }
  0x1e   :  { %650 = vmatprep.mubr.bf16.mxu0 %v1008_v5  ;;  %691 = vmatprep.mubr.bf16.mxu1 %v1008_v5  ;;  %v921_v15 = vcombine.high %v20_v2, %v28_v3 }
  0x20   :  { %627 = vmatpush1.bf16.msra.mxu0 %v964_v9  ;;  %668 = vmatpush1.bf16.msra.mxu1 %v966_v10  ;;  %v94_v9 = vld [vmem:[%s1326_s0 + $0x270] sm:$0x33]  ;;  %v29_v10 = vld [vmem:[%s1326_s0 + $0x68] sm:$0xff] }
  0x21   :  { %628 = vmatprep.subr.bf16.mxu0 %v949_v11  ;;  %669 = vmatprep.subr.bf16.mxu1 %v951_v13  ;;  %v87_v11 = vld [vmem:[%s1326_s0 + $0x238] sm:$0xff]  ;;  %v936_v13 = vcombine.low %v36_v58, %v44_v59  ;;  %v989_v16 = vcombine.high %v86_v8, %v94_v9  ;;  %v923_v17 = vcombine.high %v21_v6, %v29_v10 }
  0x22   :  { %v922_v21 = vcombine.low %v21_v6, %v29_v10 }
  0x23   :  { %v528_v22 = vand.u32 %v989_v16, %v1040_v7 }
  0x24   :  { %629 = vmatpush1.bf16.msra.mxu0 %v948_v18  ;;  %670 = vmatpush1.bf16.msra.mxu1 %v950_v19  ;;  %v991_v18 = vcombine.high %v87_v11, %v95_v12  ;;  %v920_v19 = vcombine.low %v20_v2, %v28_v3 }
  0x25   :  { %630 = vmatprep.subr.bf16.mxu0 %v933_v20  ;;  %671 = vmatprep.subr.bf16.mxu1 %v935_v23  ;;  %v988_v20 = vcombine.low %v86_v8, %v94_v9  ;;  %v990_v23 = vcombine.low %v87_v11, %v95_v12 }
  0x26   :  { %v534_v24 = vand.u32 %v991_v18, %v1040_v7 }
  0x27   :  { %v525_v29 = vand.u32 %v988_v20, %v1040_v7 }
  0x28   :  { %631 = vmatpush1.bf16.msra.mxu0 %v932_v30  ;;  %672 = vmatpush1.bf16.msra.mxu1 %v934_v31  ;;  %v531_v30 = vand.u32 %v990_v23, %v1040_v7  ;;  %v973_v31 = vcombine.high %v70_v25, %v78_v26  ;;  %v63_v7 = vld [vmem:[%s1326_s0 + $0x178] sm:$0xff] }
  0x29   :  { %632 = vmatprep.subr.bf16.mxu0 %v917_v32  ;;  %673 = vmatprep.subr.bf16.mxu1 %v919_v34  ;;  %v975_v32 = vcombine.high %v71_v27, %v79_v28  ;;  %v62_v34 = vld [vmem:[%s1326_s0 + $0x170] sm:$0xff]  ;;  %v958_v45 = vcombine.low %v55_v35, %v63_v7 }
  0x2a   :  { %v956_v44 = vcombine.low %v54_v33, %v62_v34 }
  0x2c   :  { %633 = vmatpush1.bf16.msra.mxu0 %v916_v36  ;;  %674 = vmatpush1.bf16.msra.mxu1 %v918_v38  ;;  %v972_v36 = vcombine.low %v70_v25, %v78_v26  ;;  %v957_v38 = vcombine.high %v54_v33, %v62_v34 }
  0x2d   :  { %706 = vmatprep.subr.bf16.mxu0 %v516_v39  ;;  %747 = vmatprep.subr.bf16.mxu1 %v522_v41  ;;  %v959_v39 = vcombine.high %v55_v35, %v63_v7  ;;  %v46_v41 = vld [vmem:[%s1326_s0 + $0xf0] sm:$0xff] }
  0x2e   :  { %v940_v51 = vcombine.low %v38_v40, %v46_v41 }
  0x2f   :  { %994 = vmatmul.mubr.msk.bf16.vlgmr.msra.gmra.mxu0 %vm480_vm2, %v1127_v62  ;;  %995 = vmatmul.mubr.msk.bf16.vlgmr.msra.gmra.mxu1 %vm480_vm2, %v1127_v62 }
  0x30   :  { %707 = vmatpush1.bf16.msra.mxu0 %v513_v46  ;;  %748 = vmatpush1.bf16.msra.mxu1 %v519_v47  ;;  %v941_v46 = vcombine.high %v38_v40, %v46_v41  ;;  %v943_v47 = vcombine.high %v39_v42, %v47_v43 }
  0x31   :  { %708 = vmatprep.subr.bf16.mxu0 %v969_v48  ;;  %749 = vmatprep.subr.bf16.mxu1 %v971_v49  ;;  %v22_v48 = vld [vmem:[%s1326_s0 + $0x30] sm:$0xff] }
  0x32   :  { %732 = vmatprep.mubr.bf16.mxu0 %v1008_v5  ;;  %773 = vmatprep.mubr.bf16.mxu1 %v1008_v5  ;;  %v30_v49 = vld [vmem:[%s1326_s0 + $0x70] sm:$0xff] }
  0x33   :  { %v925_v53 = vcombine.high %v22_v48, %v30_v49 }
  0x34   :  { %709 = vmatpush1.bf16.msra.mxu0 %v968_v54  ;;  %750 = vmatpush1.bf16.msra.mxu1 %v970_v55  ;;  %v924_v55 = vcombine.low %v22_v48, %v30_v49 }
  0x35   :  { %710 = vmatprep.subr.bf16.mxu0 %v953_v56  ;;  %751 = vmatprep.subr.bf16.mxu1 %v955_v57 }
  0x38   :  { %711 = vmatpush1.bf16.msra.mxu0 %v952_v63  ;;  %752 = vmatpush1.bf16.msra.mxu1 %v954_v0 }
  0x39   :  { %712 = vmatprep.subr.bf16.mxu0 %v937_v1  ;;  %753 = vmatprep.subr.bf16.mxu1 %v939_v4 }
  0x3c   :  { %713 = vmatpush1.bf16.msra.mxu0 %v936_v13  ;;  %754 = vmatpush1.bf16.msra.mxu1 %v938_v14 }
  0x3d   :  { %714 = vmatprep.subr.bf16.mxu0 %v921_v15  ;;  %755 = vmatprep.subr.bf16.mxu1 %v923_v17 }
  0x40   :  { %715 = vmatpush1.bf16.msra.mxu0 %v920_v19  ;;  %756 = vmatpush1.bf16.msra.mxu1 %v922_v21 }
  0x41   :  { %788 = vmatprep.subr.bf16.mxu0 %v528_v22  ;;  %829 = vmatprep.subr.bf16.mxu1 %v534_v24 }
  0x43   :  { %996 = vmatmul.mubr.msk.bf16.vlgmr.msra.gmra.mxu0 %vm480_vm2, %v1127_v62  ;;  %997 = vmatmul.mubr.msk.bf16.vlgmr.msra.gmra.mxu1 %vm480_vm2, %v1127_v62 }
  0x44   :  { %789 = vmatpush1.bf16.msra.mxu0 %v525_v29  ;;  %830 = vmatpush1.bf16.msra.mxu1 %v531_v30 }
  0x45   :  { %790 = vmatprep.subr.bf16.mxu0 %v973_v31  ;;  %831 = vmatprep.subr.bf16.mxu1 %v975_v32 }
  0x46   :  { %814 = vmatprep.mubr.bf16.mxu0 %v1008_v5  ;;  %855 = vmatprep.mubr.bf16.mxu1 %v1008_v5  ;;  %v23_v5 = vld [vmem:[%s1326_s0 + $0x38] sm:$0xff] }
  0x47   :  { %v927_v54 = vcombine.high %v23_v5, %v31_v50  ;;  %v926_v56 = vcombine.low %v23_v5, %v31_v50 }
  0x48   :  { %791 = vmatpush1.bf16.msra.mxu0 %v972_v36  ;;  %832 = vmatpush1.bf16.msra.mxu1 %v974_v37 }
  0x49   :  { %792 = vmatprep.subr.bf16.mxu0 %v957_v38  ;;  %833 = vmatprep.subr.bf16.mxu1 %v959_v39 }
  0x4c   :  { %793 = vmatpush1.bf16.msra.mxu0 %v956_v44  ;;  %834 = vmatpush1.bf16.msra.mxu1 %v958_v45 }
  0x4d   :  { %794 = vmatprep.subr.bf16.mxu0 %v941_v46  ;;  %835 = vmatprep.subr.bf16.mxu1 %v943_v47 }
  0x50   :  { %795 = vmatpush1.bf16.msra.mxu0 %v940_v51  ;;  %836 = vmatpush1.bf16.msra.mxu1 %v942_v52 }
  0x51   :  { %796 = vmatprep.subr.bf16.mxu0 %v925_v53  ;;  %837 = vmatprep.subr.bf16.mxu1 %v927_v54 }
  0x54   :  { %797 = vmatpush1.bf16.msra.mxu0 %v924_v55  ;;  %838 = vmatpush1.bf16.msra.mxu1 %v926_v56 }
  0x57   :  { %998 = vmatmul.mubr.msk.bf16.vlgmr.msra.gmra.mxu0 %vm480_vm2, %v1127_v62  ;;  %999 = vmatmul.mubr.msk.bf16.vlgmr.msra.gmra.mxu1 %vm480_vm2, %v1127_v62 }
  0x89   :  { %v880_v26 = vpop.permute.xlu0 %879 }
  0xdb   :  { %v570_v57 = vpop.f32.mrf.mxu0  ;;  %v611_v58 = vpop.f32.mrf.mxu1 }
  0xdd   :  { %v572_v59 = vpop.f32.mrf.mxu0  ;;  %v613_v60 = vpop.f32.mrf.mxu1 }
  0xdf   :  { %v574_v61 = vpop.f32.mrf.mxu0  ;;  %v615_v63 = vpop.f32.mrf.mxu1 }
  0xe1   :  { %v575_v0 = vpop.f32.mrf.mxu0  ;;  %v616_v1 = vpop.f32.mrf.mxu1 }
  0xef   :  { %v652_v2 = vpop.f32.mrf.mxu0  ;;  %v693_v3 = vpop.f32.mrf.mxu1 }
  0xf0   :  { %v864_v20 = vmax.f32 %v570_v57, %v652_v2  ;;  %v866_v23 = vmax.f32 %v611_v58, %v693_v3 }
  0xf1   :  { %v654_v4 = vpop.f32.mrf.mxu0  ;;  %v695_v6 = vpop.f32.mrf.mxu1 }
  0xf2   :  { %v865_v27 = vmax.f32 %v572_v59, %v654_v4  ;;  %v867_v31 = vmax.f32 %v613_v60, %v695_v6 }
  0xf3   :  { %v656_v8 = vpop.f32.mrf.mxu0  ;;  %v697_v9 = vpop.f32.mrf.mxu1 }
  0xf5   :  { %v657_v10 = vpop.f32.mrf.mxu0  ;;  %v698_v11 = vpop.f32.mrf.mxu1 }
 0x103   :  { %v734_v12 = vpop.f32.mrf.mxu0  ;;  %v775_v13 = vpop.f32.mrf.mxu1 }
 0x105   :  { %v736_v14 = vpop.f32.mrf.mxu0  ;;  %v777_v62 = vpop.f32.mrf.mxu1 }
 0x107   :  { %v738_v15 = vpop.f32.mrf.mxu0  ;;  %v779_v16 = vpop.f32.mrf.mxu1 }
 0x109   :  { %v739_v17 = vpop.f32.mrf.mxu0  ;;  %v780_v18 = vpop.f32.mrf.mxu1 }
 0x117   :  { %v816_v19 = vpop.f32.mrf.mxu0  ;;  %v857_v22 = vpop.f32.mrf.mxu1 }
 0x118   :  { %v868_v21 = vmax.f32 %v734_v12, %v816_v19  ;;  %v870_v24 = vmax.f32 %v775_v13, %v857_v22 }
 0x119   :  { %v818_v25 = vpop.f32.mrf.mxu0  ;;  %v859_v30 = vpop.f32.mrf.mxu1 }
 0x11a   :  { %v872_v28 = vmax.f32 %v864_v20, %v868_v21  ;;  %v869_v29 = vmax.f32 %v736_v14, %v818_v25  ;;  %v874_v32 = vmax.f32 %v866_v23, %v870_v24  ;;  %v871_v33 = vmax.f32 %v777_v62, %v859_v30 }
 0x11b   :  { %v820_v34 = vpop.f32.mrf.mxu0  ;;  %v861_v36 = vpop.f32.mrf.mxu1 }
 0x11c   :  { %v873_v35 = vmax.f32 %v865_v27, %v869_v29  ;;  %v882_v7 = vadd.f32 %v880_v26, %v872_v28  ;;  %v875_v37 = vmax.f32 %v867_v31, %v871_v33  ;;  %v884_v38 = vadd.f32 %v880_v26, %v874_v32 }
 0x11d   :  { %v821_v39 = vpop.f32.mrf.mxu0  ;;  %v862_v41 = vpop.f32.mrf.mxu1 }
 0x11e   :  { %v883_v40 = vadd.f32 %v880_v26, %v873_v35  ;;  %v885_v42 = vadd.f32 %v880_v26, %v875_v37  ;;  %v886_v43 = vmax.f32 %v882_v7, 0.0  ;;  %v888_v45 = vmax.f32 %v884_v38, 0.0 }
 0x120   :  { %v887_v44 = vmax.f32 %v883_v40, 0.0  ;;  %v889_v46 = vmax.f32 %v885_v42, 0.0 }
 0x122   :  { %v1002_v47 = vpack.c.bf16 %v887_v44, %v886_v43  ;;  %v1003_v48 = vpack.c.bf16 %v889_v46, %v888_v45 }
 0x124   :  { %906 = vst [vmem:[%s1329_s3] sm:$0x77] %v1002_v47  ;;  %907 = vst [vmem:[%s1329_s3 + $0x8] sm:$0x77] %v1003_v48 }

// kernel: _lenet_core.3
= control target key start
LH: loop header
LB: loop body
LE: loop exit
PB: predicated region body
PF: predicated region fallthrough
CT: control target
= control target key end

     0   :  { %v2586_v34 = vmov 0   ;;  %vm444_vm0 = vcmask 900096   ;;  %vm448_vm1 = vcmask 1046528   ;;  %s3474_s0 = inlined_call_operand.vmem [shape: bf16[4,10,750], index: 0, kind: input, shape index: {}]   ;;  %s3475_s1 = inlined_call_operand.vmem [shape: bf16[750,80], index: 1, kind: input, shape index: {}]   ;;  %s3476_s2 = inlined_call_operand.vmem [shape: f32[1,80], index: 2, kind: input, shape index: {}]   ;;  %s3477_s3 = inlined_call_operand.vmem [shape: bf16[5,80,256], index: 3, kind: input, shape index: {}]   ;;  %s3478_s4 = inlined_call_operand.vmem [shape: f32[1,256], index: 4, kind: input, shape index: {}]   ;;  %s3479_s5 = inlined_call_operand.vmem [shape: bf16[256,128], index: 5, kind: input, shape index: {}]   ;;  %s3480_s6 = inlined_call_operand.vmem [shape: f32[1,128], index: 6, kind: input, shape index: {}]   ;;  %s3481_s7 = inlined_call_operand.vmem [shape: bf16[128,128], index: 7, kind: input, shape index: {}]   ;;  %s3482_s8 = inlined_call_operand.vmem [shape: f32[1,128], index: 8, kind: input, shape index: {}]   ;;  %s3483_s9 = inlined_call_operand.hbm [shape: f32[2,128], index: 9, kind: output, shape index: {}]  }
   0x1   :  { %v2643_v0 = vld [vmem:[%s3475_s1 + $0x78] sm:$0xff]   ;;  %v2666_v4 = vld [vmem:[%s3475_s1 + $0x70] sm:$0xff]   ;;  %v2690_v8 = vld [vmem:[%s3475_s1 + $0x68] sm:$0xff]  }
   0x2   :  { %v2648_v1 = vld [vmem:[%s3475_s1 + $0xf8] sm:$0xff]   ;;  %2151 = vmatprep.subr.bf16.mxu0 %v2643_v0  ;;  %v2672_v5 = vld [vmem:[%s3475_s1 + $0xf0] sm:$0xff]   ;;  %v2696_v9 = vld [vmem:[%s3475_s1 + $0xe8] sm:$0xff]  }
   0x3   :  { %v2654_v2 = vld [vmem:[%s3475_s1 + $0x38] sm:$0xff]   ;;  %2173 = vmatprep.subr.bf16.mxu1 %v2648_v1  ;;  %v2678_v6 = vld [vmem:[%s3475_s1 + $0x30] sm:$0xff]   ;;  %v2702_v10 = vld [vmem:[%s3475_s1 + $0x28] sm:$0xff]  }
   0x4   :  { %v2660_v3 = vld [vmem:[%s3475_s1 + $0xb8] sm:$0xff]   ;;  %2152 = vmatpush3.bf16.msra.mxu0 %v2654_v2  ;;  %v2684_v7 = vld [vmem:[%s3475_s1 + $0xb0] sm:$0xff]   ;;  %v2708_v11 = vld [vmem:[%s3475_s1 + $0xa8] sm:$0xff]  }
   0x5   :  { %2174 = vmatpush3.bf16.msra.mxu1 %v2660_v3  ;;  %2153 = vmatprep.subr.bf16.mxu0 %v2666_v4  ;;  %v2714_v12 = vld [vmem:[%s3475_s1 + $0x60] sm:$0xff]   ;;  %v2738_v16 = vld [vmem:[%s3475_s1 + $0x58] sm:$0xff]   ;;  %v2762_v20 = vld [vmem:[%s3475_s1 + $0x50] sm:$0xff]  }
   0x6   :  { %2175 = vmatprep.subr.bf16.mxu1 %v2672_v5  ;;  %v2720_v13 = vld [vmem:[%s3475_s1 + $0xe0] sm:$0xff]   ;;  %v2744_v17 = vld [vmem:[%s3475_s1 + $0xd8] sm:$0xff]   ;;  %v2768_v21 = vld [vmem:[%s3475_s1 + $0xd0] sm:$0xff]  }
   0x7   :  { %v2726_v14 = vld [vmem:[%s3475_s1 + $0x20] sm:$0xff]   ;;  %v2750_v18 = vld [vmem:[%s3475_s1 + $0x18] sm:$0xff]   ;;  %v2774_v22 = vld [vmem:[%s3475_s1 + $0x10] sm:$0xff]  }
   0x8   :  { %2154 = vmatpush3.bf16.msra.mxu0 %v2678_v6  ;;  %v2732_v15 = vld [vmem:[%s3475_s1 + $0xa0] sm:$0xff]   ;;  %v2756_v19 = vld [vmem:[%s3475_s1 + $0x98] sm:$0xff]   ;;  %v2780_v23 = vld [vmem:[%s3475_s1 + $0x90] sm:$0xff]  }
   0x9   :  { %2176 = vmatpush3.bf16.msra.mxu1 %v2684_v7  ;;  %2155 = vmatprep.subr.bf16.mxu0 %v2690_v8  ;;  %v2786_v24 = vld [vmem:[%s3475_s1 + $0x48] sm:$0xff]   ;;  %v2810_v28 = vld [vmem:[%s3475_s1 + $0x40] sm:$0xff]   ;;  %v2849_v37 = vld [vmem:[%s3475_s1 + $0x138] sm:$0xff]  }
   0xa   :  { %2177 = vmatprep.subr.bf16.mxu1 %v2696_v9  ;;  %v2792_v25 = vld [vmem:[%s3475_s1 + $0xc8] sm:$0xff]   ;;  %v2816_v29 = vld [vmem:[%s3475_s1 + $0xc0] sm:$0xff]   ;;  %v2855_v38 = vld [vmem:[%s3475_s1 + $0x130] sm:$0xff]  }
   0xb   :  { %v2798_v26 = vld [vmem:[%s3475_s1 + $0x8] sm:$0xff]   ;;  %v2822_v30 = vld [vmem:[%s3475_s1] sm:$0xff]   ;;  %v2885_v42 = vld [vmem:[%s3475_s1 + $0x118] sm:$0xff]  }
   0xc   :  { %2156 = vmatpush3.bf16.msra.mxu0 %v2702_v10  ;;  %v2804_v27 = vld [vmem:[%s3475_s1 + $0x88] sm:$0xff]   ;;  %v2828_v31 = vld [vmem:[%s3475_s1 + $0x80] sm:$0xff]   ;;  %v2897_v44 = vld [vmem:[%s3475_s1 + $0x110] sm:$0xff]  }
   0xd   :  { %2178 = vmatpush3.bf16.msra.mxu1 %v2708_v11  ;;  %2157 = vmatprep.subr.bf16.mxu0 %v2714_v12  ;;  %v2414_v32 = vld [vmem:[%s3474_s0] ss:$24 sps:$4 sm:$0x1f]   ;;  %v2416_v33 = vld [vmem:[%s3474_s0 + $0x4] ss:$24 sps:$4 sm:$0x1f]  }
   0xe   :  { %2179 = vmatprep.subr.bf16.mxu1 %v2720_v13  ;;  %v2417_v35 = vld [vmem:[%s3474_s0 + $0x8] ss:$24 sps:$4 sm:$0x1f]   ;;  %v2419_v36 = vld [vmem:[%s3474_s0 + $0xc] ss:$24 sps:$4 sm:$0x1f]   ;;  %484 = vmatprep.mubr.bf16.mxu0 %v2416_v33 }
   0xf   :  { %525 = vmatprep.mubr.bf16.mxu1 %v2419_v36  ;;  %v2864_v39 = vld [vmem:[%s3475_s1 + $0x128] sm:$0xff]   ;;  %v2872_v40 = vld [vmem:[%s3475_s1 + $0x120] sm:$0xff]   ;;  %v2428_v47 = vld [vmem:[%s3475_s1 + $0x170] sm:$0x7f]  }
  0x10   :  { %2158 = vmatpush3.bf16.msra.mxu0 %v2726_v14  ;;  %v2432_v41 = vld [vmem:[%s3474_s0 + $0x34] ss:$24 sps:$4 sm:$0x1f]   ;;  %v2914_v46 = vld [vmem:[%s3475_s1 + $0x100] sm:$0xff]   ;;  %v2932_v50 = vsel %vm448_vm1, %v2428_v47, 0  ;;  %v2956_v53 = vld [vmem:[%s3475_s1 + $0x158] sm:$0xff]  }
  0x11   :  { %2180 = vmatpush3.bf16.msra.mxu1 %v2732_v15  ;;  %2159 = vmatprep.subr.bf16.mxu0 %v2738_v16  ;;  %v2438_v43 = vld [vmem:[%s3474_s0 + $0x14] ss:$24 sps:$4 sm:$0x1f]   ;;  %v2430_v48 = vld [vmem:[%s3474_s0 + $0x30] ss:$24 sps:$4 sm:$0x1f]  }
  0x12   :  { %2181 = vmatprep.subr.bf16.mxu1 %v2744_v17  ;;  %v2907_v45 = vld [vmem:[%s3475_s1 + $0x108] sm:$0xff]   ;;  %v2443_v49 = vld [vmem:[%s3474_s0 + $0x3c] ss:$24 sps:$4 sm:$0x1f]   ;;  %v2949_v52 = vld [vmem:[%s3475_s1 + $0x160] sm:$0xff]  }
  0x13   :  { %v2938_v51 = vld [vmem:[%s3475_s1 + $0x168] sm:$0xff]   ;;  %v2965_v54 = vld [vmem:[%s3475_s1 + $0x150] sm:$0xff]   ;;  %v2983_v56 = vld [vmem:[%s3475_s1 + $0x140] sm:$0xff]  }
  0x14   :  { %2160 = vmatpush3.bf16.msra.mxu0 %v2750_v18  ;;  %v2976_v55 = vld [vmem:[%s3475_s1 + $0x148] sm:$0xff]   ;;  %v2447_v58 = vld [vmem:[%s3474_s0 + $0x44] ss:$24 sps:$4 sm:$0x1f]  }
  0x15   :  { %2182 = vmatpush3.bf16.msra.mxu1 %v2756_v19  ;;  %2161 = vmatprep.subr.bf16.mxu0 %v2762_v20  ;;  %v2440_v57 = vld [vmem:[%s3474_s0 + $0x10] ss:$24 sps:$4 sm:$0x1f]  }
  0x16   :  { %2183 = vmatprep.subr.bf16.mxu1 %v2768_v21 }
  0x18   :  { %2162 = vmatpush3.bf16.msra.mxu0 %v2774_v22 }
  0x19   :  { %2184 = vmatpush3.bf16.msra.mxu1 %v2780_v23  ;;  %2163 = vmatprep.subr.bf16.mxu0 %v2786_v24 }
  0x1a   :  { %2185 = vmatprep.subr.bf16.mxu1 %v2792_v25 }
  0x1c   :  { %2164 = vmatpush3.bf16.msra.mxu0 %v2798_v26 }
  0x1d   :  { %2186 = vmatpush3.bf16.msra.mxu1 %v2804_v27  ;;  %2165 = vmatprep.subr.bf16.mxu0 %v2810_v28 }
  0x1e   :  { %2187 = vmatprep.subr.bf16.mxu1 %v2816_v29 }
  0x20   :  { %2166 = vmatpush3.bf16.msra.mxu0 %v2822_v30 }
  0x21   :  { %2188 = vmatpush3.bf16.msra.mxu1 %v2828_v31  ;;  %534 = vmatprep.subr.bf16.mxu0 %v2586_v34 }
  0x22   :  { %2195 = vmatprep.subr.bf16.mxu1 %v2643_v0 }
  0x23   :  { %485 = vmatmul.mubr.bf16.vlgmr.msra.gmra.mxu0 %v2414_v32 }
  0x24   :  { %526 = vmatmul.mubr.bf16.vlgmr.msra.gmra.mxu1 %v2417_v35  ;;  %535 = vmatpush1.bf16.msra.mxu0 %v2849_v37 }
  0x25   :  { %536 = vmatprep.subr.bf16.mxu0 %v2586_v34  ;;  %2196 = vmatpush3.bf16.msra.mxu1 %v2654_v2 }
  0x26   :  { %2197 = vmatprep.subr.bf16.mxu1 %v2666_v4  ;;  %646 = vmatprep.mubr.bf16.mxu1 %v2432_v41 }
  0x27   :  { %1989 = vmatprep.mubr.msk.bf16.mxu0 %vm444_vm0, %v2438_v43 }
  0x28   :  { %537 = vmatpush1.bf16.msra.mxu0 %v2855_v38 }
  0x29   :  { %538 = vmatprep.subr.bf16.mxu0 %v2586_v34  ;;  %2198 = vmatpush3.bf16.msra.mxu1 %v2678_v6 }
  0x2a   :  { %2199 = vmatprep.subr.bf16.mxu1 %v2690_v8 }
  0x2c   :  { %539 = vmatpush1.bf16.msra.mxu0 %v2864_v39 }
  0x2d   :  { %540 = vmatprep.subr.bf16.mxu0 %v2586_v34  ;;  %2200 = vmatpush3.bf16.msra.mxu1 %v2702_v10 }
  0x2e   :  { %2201 = vmatprep.subr.bf16.mxu1 %v2714_v12 }
  0x30   :  { %541 = vmatpush1.bf16.msra.mxu0 %v2872_v40 }
  0x31   :  { %542 = vmatprep.subr.bf16.mxu0 %v2586_v34  ;;  %2202 = vmatpush3.bf16.msra.mxu1 %v2726_v14 }
  0x32   :  { %2203 = vmatprep.subr.bf16.mxu1 %v2738_v16 }
  0x34   :  { %543 = vmatpush1.bf16.msra.mxu0 %v2885_v42 }
  0x35   :  { %544 = vmatprep.subr.bf16.mxu0 %v2586_v34  ;;  %2204 = vmatpush3.bf16.msra.mxu1 %v2750_v18 }
  0x36   :  { %2205 = vmatprep.subr.bf16.mxu1 %v2762_v20 }
  0x38   :  { %545 = vmatpush1.bf16.msra.mxu0 %v2897_v44 }
  0x39   :  { %546 = vmatprep.subr.bf16.mxu0 %v2586_v34  ;;  %2206 = vmatpush3.bf16.msra.mxu1 %v2774_v22 }
  0x3a   :  { %2207 = vmatprep.subr.bf16.mxu1 %v2786_v24 }
  0x3c   :  { %547 = vmatpush1.bf16.msra.mxu0 %v2907_v45 }
  0x3d   :  { %548 = vmatprep.subr.bf16.mxu0 %v2586_v34  ;;  %2208 = vmatpush3.bf16.msra.mxu1 %v2798_v26 }
  0x3e   :  { %2209 = vmatprep.subr.bf16.mxu1 %v2810_v28 }
  0x40   :  { %549 = vmatpush1.bf16.msra.mxu0 %v2914_v46 }
  0x41   :  { %552 = vmatprep.subr.bf16.mxu0 %v2586_v34  ;;  %2210 = vmatpush3.bf16.msra.mxu1 %v2822_v30 }
  0x42   :  { %2217 = vmatprep.subr.bf16.mxu1 %v2648_v1 }
  0x44   :  { %553 = vmatpush2.bf16.msra.mxu0 %v2932_v50  ;;  %647 = vmatmul.mubr.bf16.vlgmr.msra.gmra.mxu1 %v2430_v48 }
  0x45   :  { %554 = vmatprep.subr.bf16.mxu0 %v2586_v34  ;;  %2218 = vmatpush3.bf16.msra.mxu1 %v2660_v3 }
  0x46   :  { %2219 = vmatprep.subr.bf16.mxu1 %v2672_v5  ;;  %687 = vmatprep.mubr.bf16.mxu1 %v2443_v49 }
  0x48   :  { %555 = vmatpush2.bf16.msra.mxu0 %v2938_v51 }
  0x49   :  { %556 = vmatprep.subr.bf16.mxu0 %v2586_v34  ;;  %2220 = vmatpush3.bf16.msra.mxu1 %v2684_v7 }
  0x4a   :  { %2221 = vmatprep.subr.bf16.mxu1 %v2696_v9 }
  0x4c   :  { %557 = vmatpush2.bf16.msra.mxu0 %v2949_v52 }
  0x4d   :  { %558 = vmatprep.subr.bf16.mxu0 %v2586_v34  ;;  %2222 = vmatpush3.bf16.msra.mxu1 %v2708_v11 }
  0x4e   :  { %2223 = vmatprep.subr.bf16.mxu1 %v2720_v13 }
  0x50   :  { %559 = vmatpush2.bf16.msra.mxu0 %v2956_v53 }
  0x51   :  { %560 = vmatprep.subr.bf16.mxu0 %v2586_v34  ;;  %2224 = vmatpush3.bf16.msra.mxu1 %v2732_v15 }
  0x52   :  { %2225 = vmatprep.subr.bf16.mxu1 %v2744_v17 }
  0x54   :  { %561 = vmatpush2.bf16.msra.mxu0 %v2965_v54 }
  0x55   :  { %562 = vmatprep.subr.bf16.mxu0 %v2586_v34  ;;  %2226 = vmatpush3.bf16.msra.mxu1 %v2756_v19 }
  0x56   :  { %2227 = vmatprep.subr.bf16.mxu1 %v2768_v21 }
  0x58   :  { %563 = vmatpush2.bf16.msra.mxu0 %v2976_v55 }
  0x59   :  { %564 = vmatprep.subr.bf16.mxu0 %v2586_v34  ;;  %2228 = vmatpush3.bf16.msra.mxu1 %v2780_v23 }
  0x5a   :  { %2229 = vmatprep.subr.bf16.mxu1 %v2792_v25 }
  0x5c   :  { %565 = vmatpush2.bf16.msra.mxu0 %v2983_v56 }
  0x5d   :  { %696 = vmatprep.subr.bf16.mxu0 %v2586_v34  ;;  %2230 = vmatpush3.bf16.msra.mxu1 %v2804_v27 }
  0x5e   :  { %2231 = vmatprep.subr.bf16.mxu1 %v2816_v29 }
  0x5f   :  { %567 = vmatmul.mubr.bf16.vlgmr.msra.gmra.mxu0 %v2440_v57 }
  0x60   :  { %14 = vsyncpa [#allocation3], 0  ;;  %697 = vmatpush1.bf16.msra.mxu0 %v2849_v37  ;;  %v2441_v59 = vld [vmem:[%s3474_s0 + $0x38] ss:$24 sps:$4 sm:$0x1f]   ;;  %2002 = vmatprep.mubr.msk.bf16.mxu0 %vm444_vm0, %v2447_v58  ;;  %vm1152_vm2 = vcmask 654336  }
  0x61   :  { %698 = vmatprep.subr.bf16.mxu0 %v2586_v34  ;;  %2232 = vmatpush3.bf16.msra.mxu1 %v2828_v31  ;;  %v2446_v60 = vld [vmem:[%s3474_s0 + $0x64] ss:$24 sps:$4 sm:$0x1f]   ;;  %v2444_v61 = vld [vmem:[%s3474_s0 + $0x60] ss:$24 sps:$4 sm:$0x1f]  }
  0x62   :  { %2239 = vmatprep.subr.bf16.mxu1 %v2643_v0  ;;  %v2452_v62 = vld [vmem:[%s3474_s0 + $0x6c] ss:$24 sps:$4 sm:$0x1f]   ;;  %v2449_v63 = vld [vmem:[%s3474_s0 + $0x40] ss:$24 sps:$4 sm:$0x1f]  }
  0x63   :  { %v2456_v32 = vld [vmem:[%s3474_s0 + $0x74] ss:$24 sps:$4 sm:$0x1f]   ;;  %v2450_v33 = vld [vmem:[%s3474_s0 + $0x68] ss:$24 sps:$4 sm:$0x1f]  }
  0x64   :  { %699 = vmatpush1.bf16.msra.mxu0 %v2855_v38  ;;  %688 = vmatmul.mubr.bf16.vlgmr.msra.gmra.mxu1 %v2441_v59  ;;  %v2455_v35 = vld [vmem:[%s3474_s0 + $0x94] ss:$24 sps:$4 sm:$0x1f]   ;;  %v2471_v47 = vld [vmem:[%s3477_s3 + $0x80] ss:$8 sps:$4 sm:$0xff]   ;;  %vm2588_vm3 = vmmov 0  }
  0x65   :  { %700 = vmatprep.subr.bf16.mxu0 %v2586_v34  ;;  %2240 = vmatpush3.bf16.msra.mxu1 %v2654_v2  ;;  %v2467_v41 = vld [vmem:[%s3477_s3 + $0x94] ss:$8 sps:$4 sm:$0xff]   ;;  %v2474_v48 = vld [vmem:[%s3477_s3 + $0x120] ss:$8 sps:$4 sm:$0xff]   ;;  %v2480_v57 = vld [vmem:[%s3477_s3 + $0x110] ss:$8 sps:$4 sm:$0xff]  }
  0x66   :  { %2241 = vmatprep.subr.bf16.mxu1 %v2666_v4  ;;  %810 = vmatprep.mubr.bf16.mxu1 %v2446_v60  ;;  %v2470_v43 = vld [vmem:[%s3477_s3 + $0x134] ss:$8 sps:$4 sm:$0xff]   ;;  %v2485_v60 = vld [vmem:[%s3477_s3 + $0x64] ss:$8 sps:$4 sm:$0xff]  }
  0x68   :  { %701 = vmatpush1.bf16.msra.mxu0 %v2864_v39 }
  0x69   :  { %702 = vmatprep.subr.bf16.mxu0 %v2586_v34  ;;  %2242 = vmatpush3.bf16.msra.mxu1 %v2678_v6 }
  0x6a   :  { %2243 = vmatprep.subr.bf16.mxu1 %v2690_v8 }
  0x6c   :  { %703 = vmatpush1.bf16.msra.mxu0 %v2872_v40 }
  0x6d   :  { %704 = vmatprep.subr.bf16.mxu0 %v2586_v34  ;;  %2244 = vmatpush3.bf16.msra.mxu1 %v2702_v10 }
  0x6e   :  { %2245 = vmatprep.subr.bf16.mxu1 %v2714_v12 }
  0x70   :  { %705 = vmatpush1.bf16.msra.mxu0 %v2885_v42 }
  0x71   :  { %706 = vmatprep.subr.bf16.mxu0 %v2586_v34  ;;  %2246 = vmatpush3.bf16.msra.mxu1 %v2726_v14 }
  0x72   :  { %2247 = vmatprep.subr.bf16.mxu1 %v2738_v16 }
  0x74   :  { %707 = vmatpush1.bf16.msra.mxu0 %v2897_v44 }
  0x75   :  { %708 = vmatprep.subr.bf16.mxu0 %v2586_v34  ;;  %2248 = vmatpush3.bf16.msra.mxu1 %v2750_v18 }
  0x76   :  { %2249 = vmatprep.subr.bf16.mxu1 %v2762_v20 }
  0x78   :  { %709 = vmatpush1.bf16.msra.mxu0 %v2907_v45 }
  0x79   :  { %710 = vmatprep.subr.bf16.mxu0 %v2586_v34  ;;  %2250 = vmatpush3.bf16.msra.mxu1 %v2774_v22 }
  0x7a   :  { %2251 = vmatprep.subr.bf16.mxu1 %v2786_v24 }
  0x7c   :  { %711 = vmatpush1.bf16.msra.mxu0 %v2914_v46 }
  0x7d   :  { %714 = vmatprep.subr.bf16.mxu0 %v2586_v34  ;;  %2252 = vmatpush3.bf16.msra.mxu1 %v2798_v26 }
  0x7e   :  { %2253 = vmatprep.subr.bf16.mxu1 %v2810_v28 }
  0x80   :  { %715 = vmatpush2.bf16.msra.mxu0 %v2932_v50 }
  0x81   :  { %716 = vmatprep.subr.bf16.mxu0 %v2586_v34  ;;  %2254 = vmatpush3.bf16.msra.mxu1 %v2822_v30 }
  0x82   :  { %2261 = vmatprep.subr.bf16.mxu1 %v2648_v1 }
  0x84   :  { %717 = vmatpush2.bf16.msra.mxu0 %v2938_v51  ;;  %811 = vmatmul.mubr.bf16.vlgmr.msra.gmra.mxu1 %v2444_v61  ;;  %v2483_v61 = vld [vmem:[%s3477_s3 + $0x60] ss:$8 sps:$4 sm:$0xff]  }
  0x85   :  { %718 = vmatprep.subr.bf16.mxu0 %v2586_v34  ;;  %2262 = vmatpush3.bf16.msra.mxu1 %v2660_v3 }
  0x86   :  { %2263 = vmatprep.subr.bf16.mxu1 %v2672_v5  ;;  %851 = vmatprep.mubr.bf16.mxu1 %v2452_v62  ;;  %v2488_v62 = vld [vmem:[%s3477_s3 + $0x104] ss:$8 sps:$4 sm:$0xff]  }
  0x88   :  { %719 = vmatpush2.bf16.msra.mxu0 %v2949_v52 }
  0x89   :  { %720 = vmatprep.subr.bf16.mxu0 %v2586_v34  ;;  %2264 = vmatpush3.bf16.msra.mxu1 %v2684_v7 }
  0x8a   :  { %2265 = vmatprep.subr.bf16.mxu1 %v2696_v9 }
  0x8c   :  { %721 = vmatpush2.bf16.msra.mxu0 %v2956_v53 }
  0x8d   :  { %722 = vmatprep.subr.bf16.mxu0 %v2586_v34  ;;  %2266 = vmatpush3.bf16.msra.mxu1 %v2708_v11 }
  0x8e   :  { %2267 = vmatprep.subr.bf16.mxu1 %v2720_v13 }
  0x90   :  { %723 = vmatpush2.bf16.msra.mxu0 %v2965_v54 }
  0x91   :  { %724 = vmatprep.subr.bf16.mxu0 %v2586_v34  ;;  %2268 = vmatpush3.bf16.msra.mxu1 %v2732_v15 }
  0x92   :  { %2269 = vmatprep.subr.bf16.mxu1 %v2744_v17 }
  0x94   :  { %725 = vmatpush2.bf16.msra.mxu0 %v2976_v55 }
  0x95   :  { %726 = vmatprep.subr.bf16.mxu0 %v2586_v34  ;;  %2270 = vmatpush3.bf16.msra.mxu1 %v2756_v19 }
  0x96   :  { %2271 = vmatprep.subr.bf16.mxu1 %v2768_v21 }
  0x98   :  { %727 = vmatpush2.bf16.msra.mxu0 %v2983_v56 }
  0x99   :  { %860 = vmatprep.subr.bf16.mxu0 %v2586_v34  ;;  %2272 = vmatpush3.bf16.msra.mxu1 %v2780_v23 }
  0x9a   :  { %2273 = vmatprep.subr.bf16.mxu1 %v2792_v25 }
  0x9b   :  { %729 = vmatmul.mubr.bf16.vlgmr.msra.gmra.mxu0 %v2449_v63  ;;  %v2486_v63 = vld [vmem:[%s3477_s3 + $0x100] ss:$8 sps:$4 sm:$0xff]  }
  0x9c   :  { %861 = vmatpush1.bf16.msra.mxu0 %v2849_v37  ;;  %2015 = vmatprep.mubr.msk.bf16.mxu0 %vm444_vm0, %v2456_v32 }
  0x9d   :  { %862 = vmatprep.subr.bf16.mxu0 %v2586_v34  ;;  %2274 = vmatpush3.bf16.msra.mxu1 %v2804_v27 }
  0x9e   :  { %2275 = vmatprep.subr.bf16.mxu1 %v2816_v29 }
  0xa0   :  { %863 = vmatpush1.bf16.msra.mxu0 %v2855_v38 }
  0xa1   :  { %864 = vmatprep.subr.bf16.mxu0 %v2586_v34  ;;  %2276 = vmatpush3.bf16.msra.mxu1 %v2828_v31 }
  0xa2   :  { %2283 = vmatprep.subr.bf16.mxu1 %v2643_v0  ;;  %v2453_v0 = vld [vmem:[%s3474_s0 + $0x90] ss:$24 sps:$4 sm:$0x1f]  }
  0xa4   :  { %865 = vmatpush1.bf16.msra.mxu0 %v2864_v39  ;;  %852 = vmatmul.mubr.bf16.vlgmr.msra.gmra.mxu1 %v2450_v33  ;;  %v2491_v33 = vld [vmem:[%s3477_s3 + $0x54] ss:$8 sps:$4 sm:$0xff]  }
  0xa5   :  { %866 = vmatprep.subr.bf16.mxu0 %v2586_v34  ;;  %2284 = vmatpush3.bf16.msra.mxu1 %v2654_v2  ;;  %v2461_v2 = vld [vmem:[%s3474_s0 + $0x9c] ss:$24 sps:$4 sm:$0x1f]  }
  0xa6   :  { %2285 = vmatprep.subr.bf16.mxu1 %v2666_v4  ;;  %974 = vmatprep.mubr.bf16.mxu1 %v2455_v35  ;;  %v2459_v4 = vld [vmem:[%s3474_s0 + $0x98] ss:$24 sps:$4 sm:$0x1f]  }
  0xa8   :  { %867 = vmatpush1.bf16.msra.mxu0 %v2872_v40 }
  0xa9   :  { %868 = vmatprep.subr.bf16.mxu0 %v2586_v34  ;;  %2286 = vmatpush3.bf16.msra.mxu1 %v2678_v6 }
  0xaa   :  { %2287 = vmatprep.subr.bf16.mxu1 %v2690_v8 }
  0xac   :  { %869 = vmatpush1.bf16.msra.mxu0 %v2885_v42 }
  0xad   :  { %870 = vmatprep.subr.bf16.mxu0 %v2586_v34  ;;  %2288 = vmatpush3.bf16.msra.mxu1 %v2702_v10 }
  0xae   :  { %2289 = vmatprep.subr.bf16.mxu1 %v2714_v12 }
  0xb0   :  { %871 = vmatpush1.bf16.msra.mxu0 %v2897_v44 }
  0xb1   :  { %872 = vmatprep.subr.bf16.mxu0 %v2586_v34  ;;  %2290 = vmatpush3.bf16.msra.mxu1 %v2726_v14 }
  0xb2   :  { %2291 = vmatprep.subr.bf16.mxu1 %v2738_v16 }
  0xb4   :  { %873 = vmatpush1.bf16.msra.mxu0 %v2907_v45 }
  0xb5   :  { %874 = vmatprep.subr.bf16.mxu0 %v2586_v34  ;;  %2292 = vmatpush3.bf16.msra.mxu1 %v2750_v18 }
  0xb6   :  { %2293 = vmatprep.subr.bf16.mxu1 %v2762_v20 }
  0xb8   :  { %875 = vmatpush1.bf16.msra.mxu0 %v2914_v46 }
  0xb9   :  { %878 = vmatprep.subr.bf16.mxu0 %v2586_v34  ;;  %2294 = vmatpush3.bf16.msra.mxu1 %v2774_v22  ;;  %v2464_v22 = vld [vmem:[%s3474_s0 + $0xa0] ss:$24 sps:$4 sm:$0x1f]  }
  0xba   :  { %2295 = vmatprep.subr.bf16.mxu1 %v2786_v24 }
  0xbc   :  { %879 = vmatpush2.bf16.msra.mxu0 %v2932_v50 }
  0xbd   :  { %880 = vmatprep.subr.bf16.mxu0 %v2586_v34  ;;  %2296 = vmatpush3.bf16.msra.mxu1 %v2798_v26 }
  0xbe   :  { %2297 = vmatprep.subr.bf16.mxu1 %v2810_v28 }
  0xc0   :  { %881 = vmatpush2.bf16.msra.mxu0 %v2938_v51 }
  0xc1   :  { %882 = vmatprep.subr.bf16.mxu0 %v2586_v34  ;;  %2298 = vmatpush3.bf16.msra.mxu1 %v2822_v30 }
  0xc2   :  { %2305 = vmatprep.subr.bf16.mxu1 %v2648_v1  ;;  %v2458_v1 = vld [vmem:[%s3474_s0 + $0x70] ss:$24 sps:$4 sm:$0x1f]  }
  0xc4   :  { %883 = vmatpush2.bf16.msra.mxu0 %v2949_v52  ;;  %975 = vmatmul.mubr.bf16.vlgmr.msra.gmra.mxu1 %v2453_v0  ;;  %v2489_v0 = vld [vmem:[%s3477_s3 + $0x50] ss:$8 sps:$4 sm:$0xff]  }
  0xc5   :  { %884 = vmatprep.subr.bf16.mxu0 %v2586_v34  ;;  %2306 = vmatpush3.bf16.msra.mxu1 %v2660_v3  ;;  %v2462_v3 = vld [vmem:[%s3474_s0 + $0xa4] ss:$24 sps:$4 sm:$0x1f]  }
  0xc6   :  { %2307 = vmatprep.subr.bf16.mxu1 %v2672_v5  ;;  %1015 = vmatprep.mubr.bf16.mxu1 %v2461_v2  ;;  %v2494_v2 = vld [vmem:[%s3477_s3 + $0xf4] ss:$8 sps:$4 sm:$0xff]  }
  0xc8   :  { %885 = vmatpush2.bf16.msra.mxu0 %v2956_v53 }
  0xc9   :  { %886 = vmatprep.subr.bf16.mxu0 %v2586_v34  ;;  %2308 = vmatpush3.bf16.msra.mxu1 %v2684_v7 }
  0xca   :  { %2309 = vmatprep.subr.bf16.mxu1 %v2696_v9 }
  0xcc   :  { %887 = vmatpush2.bf16.msra.mxu0 %v2965_v54 }
  0xcd   :  { %888 = vmatprep.subr.bf16.mxu0 %v2586_v34  ;;  %2310 = vmatpush3.bf16.msra.mxu1 %v2708_v11 }
  0xce   :  { %2311 = vmatprep.subr.bf16.mxu1 %v2720_v13 }
  0xd0   :  { %889 = vmatpush2.bf16.msra.mxu0 %v2976_v55 }
  0xd1   :  { %890 = vmatprep.subr.bf16.mxu0 %v2586_v34  ;;  %2312 = vmatpush3.bf16.msra.mxu1 %v2732_v15 }
  0xd2   :  { %2313 = vmatprep.subr.bf16.mxu1 %v2744_v17 }
  0xd4   :  { %891 = vmatpush2.bf16.msra.mxu0 %v2983_v56 }
  0xd5   :  { %1024 = vmatprep.subr.bf16.mxu0 %v2586_v34  ;;  %2314 = vmatpush3.bf16.msra.mxu1 %v2756_v19 }
  0xd6   :  { %2315 = vmatprep.subr.bf16.mxu1 %v2768_v21 }
  0xd7   :  { %893 = vmatmul.mubr.bf16.vlgmr.msra.gmra.mxu0 %v2458_v1 }
  0xd8   :  { %1025 = vmatpush1.bf16.msra.mxu0 %v2849_v37  ;;  %2028 = vmatprep.mubr.msk.bf16.mxu0 %vm444_vm0, %v2462_v3  ;;  %v2492_v3 = vld [vmem:[%s3477_s3 + $0xf0] ss:$8 sps:$4 sm:$0xff]  }
  0xd9   :  { %1026 = vmatprep.subr.bf16.mxu0 %v2586_v34  ;;  %2316 = vmatpush3.bf16.msra.mxu1 %v2780_v23 }
  0xda   :  { %2317 = vmatprep.subr.bf16.mxu1 %v2792_v25 }
  0xdc   :  { %1027 = vmatpush1.bf16.msra.mxu0 %v2855_v38 }
  0xdd   :  { %1028 = vmatprep.subr.bf16.mxu0 %v2586_v34  ;;  %2318 = vmatpush3.bf16.msra.mxu1 %v2804_v27 }
  0xde   :  { %2319 = vmatprep.subr.bf16.mxu1 %v2816_v29 }
  0xe0   :  { %1029 = vmatpush1.bf16.msra.mxu0 %v2864_v39 }
  0xe1   :  { %1030 = vmatprep.subr.bf16.mxu0 %v2586_v34  ;;  %2320 = vmatpush3.bf16.msra.mxu1 %v2828_v31 }
  0xe2   :  { %1162 = vmatprep.subr.bf16.mxu1 %v2467_v41 }
  0xe3   :  { %v2167_v5 = vpop.f32.mrf.mxu0 }
  0xe4   :  { %v2189_v6 = vpop.f32.mrf.mxu1  ;;  %1031 = vmatpush1.bf16.msra.mxu0 %v2872_v40  ;;  %1016 = vmatmul.mubr.bf16.vlgmr.msra.gmra.mxu1 %v2459_v4  ;;  %v2465_v40 = vld [vmem:[%s3477_s3 + $0x90] ss:$8 sps:$4 sm:$0xff]  }
  0xe5   :  { %v2168_v7 = vpop.f32.mrf.mxu0  ;;  %1032 = vmatprep.subr.bf16.mxu0 %v2586_v34  ;;  %1188 = vmatprep.mubr.bf16.mxu1 %v2586_v34 }
  0xe6   :  { %v2169_v8 = vadd.f32 %v2168_v7, %v2167_v5  ;;  %v2190_v9 = vpop.f32.mrf.mxu1  ;;  %1163 = vmatpush1.bf16.msra.mxu1 %v2465_v40 }
  0xe7   :  { %v2170_v10 = vpop.f32.mrf.mxu0  ;;  %v2191_v23 = vadd.f32 %v2190_v9, %v2189_v6  ;;  %v2497_v6 = vld [vmem:[%s3477_s3 + $0x44] ss:$8 sps:$4 sm:$0xff]  }
  0xe8   :  { %v2192_v11 = vpop.f32.mrf.mxu1  ;;  %1033 = vmatpush1.bf16.msra.mxu0 %v2885_v42  ;;  %v2468_v42 = vld [vmem:[%s3477_s3 + $0x130] ss:$8 sps:$4 sm:$0xff]  }
  0xe9   :  { %v2171_v12 = vpop.f32.mrf.mxu0  ;;  %1034 = vmatprep.subr.bf16.mxu0 %v2586_v34  ;;  %v528_v24 = vadd.f32 %v2191_v23, %v2169_v8 }
  0xea   :  { %v2172_v13 = vadd.f32 %v2171_v12, %v2170_v10  ;;  %v2193_v14 = vpop.f32.mrf.mxu1 }
  0xeb   :  { %v2194_v15 = vadd.f32 %v2193_v14, %v2192_v11 }
  0xec   :  { %1035 = vmatpush1.bf16.msra.mxu0 %v2897_v44  ;;  %v2473_v44 = vld [vmem:[%s3477_s3 + $0x84] ss:$8 sps:$4 sm:$0xff]  }
  0xed   :  { %1036 = vmatprep.subr.bf16.mxu0 %v2586_v34  ;;  %v531_v16 = vadd.f32 %v2194_v15, %v2172_v13  ;;  %1164 = vmatprep.subr.bf16.mxu1 %v2473_v44 }
  0xee   :  { %1165 = vmatpush1.bf16.msra.mxu1 %v2471_v47  ;;  %v3275_v47 = vld [vmem:[%s3476_s2] ss:$0 sm:$0xff] }
  0xf0   :  { %1037 = vmatpush1.bf16.msra.mxu0 %v2907_v45 }
  0xf1   :  { %1038 = vmatprep.subr.bf16.mxu0 %v2586_v34 }
  0xf4   :  { %1039 = vmatpush1.bf16.msra.mxu0 %v2914_v46  ;;  %v2476_v46 = vld [vmem:[%s3477_s3 + $0x124] ss:$8 sps:$4 sm:$0xff]  }
  0xf5   :  { %1042 = vmatprep.subr.bf16.mxu0 %v2586_v34 }
  0xf8   :  { %1043 = vmatpush2.bf16.msra.mxu0 %v2932_v50 }
  0xf9   :  { %1044 = vmatprep.subr.bf16.mxu0 %v2586_v34 }
  0xfc   :  { %1045 = vmatpush2.bf16.msra.mxu0 %v2938_v51 }
  0xfd   :  { %1046 = vmatprep.subr.bf16.mxu0 %v2586_v34 }
 0x100   :  { %1047 = vmatpush2.bf16.msra.mxu0 %v2949_v52 }
 0x101   :  { %1048 = vmatprep.subr.bf16.mxu0 %v2586_v34 }
 0x104   :  { %1049 = vmatpush2.bf16.msra.mxu0 %v2956_v53  ;;  %v2211_v17 = vpop.f32.mrf.mxu1 }
 0x105   :  { %1050 = vmatprep.subr.bf16.mxu0 %v2586_v34 }
 0x106   :  { %v2212_v18 = vpop.f32.mrf.mxu1 }
 0x107   :  { %v2213_v58 = vadd.f32 %v2212_v18, %v2211_v17 }
 0x108   :  { %1051 = vmatpush2.bf16.msra.mxu0 %v2965_v54  ;;  %v2214_v19 = vpop.f32.mrf.mxu1  ;;  %v2479_v54 = vld [vmem:[%s3477_s3 + $0x74] ss:$8 sps:$4 sm:$0xff]  }
 0x109   :  { %1052 = vmatprep.subr.bf16.mxu0 %v2586_v34  ;;  %1166 = vmatprep.subr.bf16.mxu1 %v2479_v54 }
 0x10a   :  { %v2215_v20 = vpop.f32.mrf.mxu1 }
 0x10b   :  { %v2216_v21 = vadd.f32 %v2215_v20, %v2214_v19 }
 0x10c   :  { %1053 = vmatpush2.bf16.msra.mxu0 %v2976_v55  ;;  %v2477_v55 = vld [vmem:[%s3477_s3 + $0x70] ss:$8 sps:$4 sm:$0xff]  }
 0x10d   :  { %1054 = vmatprep.subr.bf16.mxu0 %v2586_v34  ;;  %1167 = vmatpush1.bf16.msra.mxu1 %v2477_v55 }
 0x10e   :  { %1168 = vmatprep.subr.bf16.mxu1 %v2485_v60 }
 0x110   :  { %1055 = vmatpush2.bf16.msra.mxu0 %v2983_v56  ;;  %v2482_v56 = vld [vmem:[%s3477_s3 + $0x114] ss:$8 sps:$4 sm:$0xff]  }
 0x111   :  { %1470 = vmatprep.subr.bf16.mxu0 %v2470_v43  ;;  %1169 = vmatpush1.bf16.msra.mxu1 %v2483_v61  ;;  %v2500_v61 = vld [vmem:[%s3477_s3 + $0x34] ss:$8 sps:$4 sm:$0xff]  }
 0x112   :  { %1170 = vmatprep.subr.bf16.mxu1 %v2491_v33  ;;  %v2506_v33 = vld [vmem:[%s3477_s3 + $0x14] ss:$8 sps:$4 sm:$0xff]  }
 0x113   :  { %1057 = vmatmul.mubr.bf16.vlgmr.msra.gmra.mxu0 %v2464_v22 }
 0x114   :  { %1496 = vmatprep.mubr.bf16.mxu0 %v2586_v34  ;;  %1471 = vmatpush1.bf16.msra.mxu0 %v2468_v42 }
 0x115   :  { %1472 = vmatprep.subr.bf16.mxu0 %v2476_v46  ;;  %1171 = vmatpush1.bf16.msra.mxu1 %v2489_v0  ;;  %v2509_v0 = vld [vmem:[%s3477_s3 + $0x4] ss:$8 sps:$4 sm:$0xff]  }
 0x116   :  { %1256 = vmatprep.subr.bf16.mxu1 %v2497_v6  ;;  %v2518_v6 = vld [vmem:[%s3477_s3 + $0xc4] ss:$8 sps:$4 sm:$0xff]  }
 0x118   :  { %1473 = vmatpush1.bf16.msra.mxu0 %v2474_v48 }
 0x119   :  { %1474 = vmatprep.subr.bf16.mxu0 %v2482_v56 }
 0x11c   :  { %1475 = vmatpush1.bf16.msra.mxu0 %v2480_v57 }
 0x11d   :  { %1476 = vmatprep.subr.bf16.mxu0 %v2488_v62  ;;  %v2498_v62 = vld [vmem:[%s3477_s3 + $0x30] ss:$8 sps:$4 sm:$0xff]  }
 0x11f   :  { %v568_v25 = vpop.f32.mrf.mxu0 }
 0x120   :  { %v3201_v26 = vadd.f32 %v568_v25, %v528_v24  ;;  %1477 = vmatpush1.bf16.msra.mxu0 %v2486_v63  ;;  %v2503_v63 = vld [vmem:[%s3477_s3 + $0x24] ss:$8 sps:$4 sm:$0xff]  }
 0x121   :  { %v570_v27 = vpop.f32.mrf.mxu0  ;;  %1478 = vmatprep.subr.bf16.mxu0 %v2494_v2  ;;  %v2507_v2 = vld [vmem:[%s3477_s3] ss:$8 sps:$4 sm:$0xff]  }
 0x123   :  { %v571_v28 = vpop.f32.mrf.mxu0 }
 0x124   :  { %v3203_v29 = vadd.f32 %v571_v28, %v531_v16  ;;  %v2233_v30 = vpop.f32.mrf.mxu1  ;;  %1479 = vmatpush1.bf16.msra.mxu0 %v2492_v3  ;;  %v2510_v3 = vld [vmem:[%s3477_s3 + $0xe0] ss:$8 sps:$4 sm:$0xff]  }
 0x125   :  { %v573_v31 = vpop.f32.mrf.mxu0 }
 0x126   :  { %v2234_v36 = vpop.f32.mrf.mxu1 }
 0x127   :  { %v2235_v59 = vadd.f32 %v2234_v36, %v2233_v30 }
 0x128   :  { %v2236_v37 = vpop.f32.mrf.mxu1 }
 0x129   :  { %v690_v32 = vadd.f32 %v2235_v59, %v2213_v58  ;;  %v2495_v58 = vld [vmem:[%s3477_s3 + $0x40] ss:$8 sps:$4 sm:$0xff]  }
 0x12a   :  { %v2237_v38 = vpop.f32.mrf.mxu1 }
 0x12b   :  { %v2238_v39 = vadd.f32 %v2237_v38, %v2236_v37 }
 0x12d   :  { %v693_v45 = vadd.f32 %v2238_v39, %v2216_v21 }
 0x144   :  { %v2255_v49 = vpop.f32.mrf.mxu1 }
 0x146   :  { %v2256_v50 = vpop.f32.mrf.mxu1 }
 0x147   :  { %v2257_v30 = vadd.f32 %v2256_v50, %v2255_v49 }
 0x148   :  { %v2258_v51 = vpop.f32.mrf.mxu1 }
 0x14a   :  { %v2259_v52 = vpop.f32.mrf.mxu1 }
 0x14b   :  { %v2260_v53 = vadd.f32 %v2259_v52, %v2258_v51 }
 0x15b   :  { %v730_v35 = vpop.f32.mrf.mxu0 }
 0x15c   :  { %v731_v1 = vadd.f32 %v730_v35, %v690_v32  ;;  %v2501_v32 = vld [vmem:[%s3477_s3 + $0x20] ss:$8 sps:$4 sm:$0xff]   ;;  %v2504_v35 = vld [vmem:[%s3477_s3 + $0x10] ss:$8 sps:$4 sm:$0xff]  }
 0x15d   :  { %v732_v4 = vpop.f32.mrf.mxu0 }
 0x15e   :  { %v737_v5 = vmax.f32 %v3201_v26, %v731_v1  ;;  %v2512_v1 = vld [vmem:[%s3477_s3 + $0xe4] ss:$8 sps:$4 sm:$0xff]   ;;  %v2515_v4 = vld [vmem:[%s3477_s3 + $0xd4] ss:$8 sps:$4 sm:$0xff]  }
 0x15f   :  { %v733_v7 = vpop.f32.mrf.mxu0 }
 0x160   :  { %v734_v8 = vadd.f32 %v733_v7, %v693_v45  ;;  %v2516_v7 = vld [vmem:[%s3477_s3 + $0xc0] ss:$8 sps:$4 sm:$0xff]  }
 0x161   :  { %v735_v9 = vpop.f32.mrf.mxu0 }
 0x162   :  { %v738_v10 = vmax.f32 %v3203_v29, %v734_v8  ;;  %v2521_v8 = vld [vmem:[%s3477_s3 + $0xb4] ss:$8 sps:$4 sm:$0xff]   ;;  %v2519_v9 = vld [vmem:[%s3477_s3 + $0xb0] ss:$8 sps:$4 sm:$0xff]  }
 0x164   :  { %v2277_v11 = vpop.f32.mrf.mxu1 }
 0x166   :  { %v2278_v12 = vpop.f32.mrf.mxu1 }
 0x167   :  { %v2279_v31 = vadd.f32 %v2278_v12, %v2277_v11  ;;  %v2522_v11 = vld [vmem:[%s3477_s3 + $0xa0] ss:$8 sps:$4 sm:$0xff]   ;;  %v2527_v12 = vld [vmem:[%s3477_s3 + $0x184] ss:$8 sps:$4 sm:$0xff]  }
 0x168   :  { %v2280_v13 = vpop.f32.mrf.mxu1 }
 0x169   :  { %v854_v37 = vadd.f32 %v2279_v31, %v2257_v30  ;;  %v2545_v30 = vld [vmem:[%s3479_s5 + $0x28] sm:$0xff]   ;;  %v2546_v31 = vld [vmem:[%s3479_s5 + $0x60] sm:$0xff]  }
 0x16a   :  { %v2281_v14 = vpop.f32.mrf.mxu1 }
 0x16b   :  { %v2282_v15 = vadd.f32 %v2281_v14, %v2280_v13  ;;  %v2525_v13 = vld [vmem:[%s3477_s3 + $0x180] ss:$8 sps:$4 sm:$0xff]  }
 0x16d   :  { %v857_v16 = vadd.f32 %v2282_v15, %v2260_v53  ;;  %v2530_v15 = vld [vmem:[%s3477_s3 + $0x174] ss:$8 sps:$4 sm:$0xff]  }
 0x184   :  { %v2299_v17 = vpop.f32.mrf.mxu1 }
 0x186   :  { %v2300_v18 = vpop.f32.mrf.mxu1 }
 0x187   :  { %v2301_v38 = vadd.f32 %v2300_v18, %v2299_v17  ;;  %v2533_v17 = vld [vmem:[%s3477_s3 + $0x164] ss:$8 sps:$4 sm:$0xff]   ;;  %v2531_v18 = vld [vmem:[%s3477_s3 + $0x160] ss:$8 sps:$4 sm:$0xff]  }
 0x188   :  { %v2302_v19 = vpop.f32.mrf.mxu1 }
 0x18a   :  { %v2303_v20 = vpop.f32.mrf.mxu1 }
 0x18b   :  { %v2304_v21 = vadd.f32 %v2303_v20, %v2302_v19  ;;  %v2536_v19 = vld [vmem:[%s3477_s3 + $0x154] ss:$8 sps:$4 sm:$0xff]  }
 0x197   :  { %v894_v22 = vpop.f32.mrf.mxu0 }
 0x198   :  { %v895_v41 = vadd.f32 %v894_v22, %v854_v37  ;;  %v2537_v22 = vld [vmem:[%s3477_s3 + $0x140] ss:$8 sps:$4 sm:$0xff]   ;;  %v2548_v37 = vld [vmem:[%s3479_s5 + $0x58] sm:$0xff]  }
 0x199   :  { %v896_v23 = vpop.f32.mrf.mxu0 }
 0x19a   :  { %v901_v45 = vmax.f32 %v737_v5, %v895_v41  ;;  %v2513_v5 = vld [vmem:[%s3477_s3 + $0xd0] ss:$8 sps:$4 sm:$0xff]   ;;  %v2552_v41 = vld [vmem:[%s3479_s5 + $0x48] sm:$0xff]  }
 0x19b   :  { %v897_v24 = vpop.f32.mrf.mxu0 }
 0x19c   :  { %v898_v25 = vadd.f32 %v897_v24, %v857_v16  ;;  %v2528_v16 = vld [vmem:[%s3477_s3 + $0x170] ss:$8 sps:$4 sm:$0xff]  }
 0x19d   :  { %v899_v26 = vpop.f32.mrf.mxu0 }
 0x19e   :  { %v3270_v27 = vmax.f32 %v738_v10, %v898_v25  ;;  %v2524_v10 = vld [vmem:[%s3477_s3 + $0xa4] ss:$8 sps:$4 sm:$0xff]   ;;  %v2540_v25 = vld [vmem:[%s3479_s5 + $0x78] sm:$0xff]  }
 0x19f   :  { %v2541_v26 = vld [vmem:[%s3479_s5 + $0x38] sm:$0xff]   ;;  %2327 = vmatprep.subr.bf16.mxu0 %v2540_v25  ;;  %v2562_v25 = vld [vmem:[%s3481_s7 + $0x8] sm:$0xff]  }
 0x1a4   :  { %v2321_v28 = vpop.f32.mrf.mxu1 }
 0x1a6   :  { %v2322_v29 = vpop.f32.mrf.mxu1 }
 0x1a7   :  { %v2323_v39 = vadd.f32 %v2322_v29, %v2321_v28  ;;  %v2543_v28 = vld [vmem:[%s3479_s5 + $0x30] sm:$0xff]   ;;  %v2544_v29 = vld [vmem:[%s3479_s5 + $0x68] sm:$0xff]  }
 0x1a8   :  { %v2324_v36 = vpop.f32.mrf.mxu1 }
 0x1a9   :  { %v1018_v43 = vadd.f32 %v2323_v39, %v2301_v38  ;;  %v2549_v38 = vld [vmem:[%s3479_s5 + $0x18] sm:$0xff]   ;;  %v2550_v39 = vld [vmem:[%s3479_s5 + $0x50] sm:$0xff]  }
 0x1aa   :  { %v2325_v40 = vpop.f32.mrf.mxu1 }
 0x1ab   :  { %v2326_v42 = vadd.f32 %v2325_v40, %v2324_v36  ;;  %v2547_v36 = vld [vmem:[%s3479_s5 + $0x20] sm:$0xff]   ;;  %v2551_v40 = vld [vmem:[%s3479_s5 + $0x10] sm:$0xff]  }
 0x1ad   :  { %v1021_v49 = vadd.f32 %v2326_v42, %v2304_v21  ;;  %v2539_v21 = vld [vmem:[%s3477_s3 + $0x144] ss:$8 sps:$4 sm:$0xff]  }
 0x1ae   :  { %v2553_v42 = vld [vmem:[%s3479_s5 + $0x8] sm:$0xff]  }
 0x1d3   :  { %v1058_v44 = vpop.f32.mrf.mxu0 }
 0x1d4   :  { %v1059_v46 = vadd.f32 %v1058_v44, %v1018_v43  ;;  %v2554_v43 = vld [vmem:[%s3479_s5 + $0x40] sm:$0xff]  }
 0x1d5   :  { %v1060_v48 = vpop.f32.mrf.mxu0  ;;  %v2555_v44 = vld [vmem:[%s3479_s5] sm:$0xff]  }
 0x1d6   :  { %v1065_v51 = vmax.f32 %v901_v45, %v1059_v46  ;;  %v2556_v45 = vld [vmem:[%s3481_s7 + $0x38] sm:$0xff]   ;;  %v2587_v46 = vmov 0.0   ;;  %v2558_v48 = vld [vmem:[%s3481_s7 + $0x28] sm:$0xff]  }
 0x1d7   :  { %v1061_v50 = vpop.f32.mrf.mxu0 }
 0x1d8   :  { %v1074_v52 = vadd.f32 %v3275_v47, %v1065_v51  ;;  %v3278_v53 = vadd.f32 %v1061_v50, %v1021_v49  ;;  %v2559_v51 = vld [vmem:[%s3481_s7 + $0x20] sm:$0xff]   ;;  %v2560_v49 = vld [vmem:[%s3481_s7 + $0x18] sm:$0xff]  }
 0x1d9   :  { %v1063_v54 = vpop.f32.mrf.mxu0 }
 0x1da   :  { %v1076_v55 = vmax.f32 %v1074_v52, 0.0  ;;  %v1066_v56 = vmax.f32 %v3270_v27, %v3278_v53  ;;  %v2542_v27 = vld [vmem:[%s3479_s5 + $0x70] sm:$0xff]  }
 0x1dc   :  { %v1078_v57 = vpack.c.bf16 %v1076_v55, %v1076_v55  ;;  %v1075_v20 = vadd.f32 %v3275_v47, %v1066_v56  ;;  %v2557_v47 = vld [vmem:[%s3481_s7 + $0x30] sm:$0xff]  }
 0x1de   :  { %v1101_v59 = vrot.slane %v1078_v57, 1  ;;  %v1410_v60 = vrot.slane %v1078_v57, 3  ;;  %v1302_v14 = vrot.slane %v1078_v57, 2  ;;  %v1077_v23 = vmax.f32 %v1075_v20, 0.0 }
 0x1e0   :  { %2050 = vmatmul.mubr.msk.bf16.vlgmr.msra.gmra.mxu1 %vm1152_vm2, %v1101_v59  ;;  %2103 = vmatmul.mubr.msk.bf16.vlgmr.msra.gmra.mxu0 %vm1152_vm2, %v1410_v60  ;;  %v1507_v24 = vpack.c.bf16 %v1077_v23, %v1077_v23 }
 0x1e1   :  { %1257 = vmatpush1.bf16.msra.mxu1 %v2495_v58  ;;  %1282 = vmatprep.mubr.bf16.mxu1 %v2586_v34 }
 0x1e2   :  { %1258 = vmatprep.subr.bf16.mxu1 %v2500_v61  ;;  %2328 = vmatpush3.bf16.msra.mxu0 %v2541_v26  ;;  %v2563_v26 = vld [vmem:[%s3481_s7] sm:$0xff]  }
 0x1e3   :  { %2329 = vmatprep.subr.bf16.mxu0 %v2542_v27 }
 0x1e5   :  { %1259 = vmatpush1.bf16.msra.mxu1 %v2498_v62 }
 0x1e6   :  { %1260 = vmatprep.subr.bf16.mxu1 %v2503_v63  ;;  %2330 = vmatpush3.bf16.msra.mxu0 %v2543_v28  ;;  %v2125_v28 = vld [vmem:[%s3480_s6] ss:$0 sm:$0xff] }
 0x1e7   :  { %2331 = vmatprep.subr.bf16.mxu0 %v2544_v29 }
 0x1e9   :  { %1261 = vmatpush1.bf16.msra.mxu1 %v2501_v32 }
 0x1ea   :  { %1262 = vmatprep.subr.bf16.mxu1 %v2506_v33  ;;  %2332 = vmatpush3.bf16.msra.mxu0 %v2545_v30 }
 0x1eb   :  { %2333 = vmatprep.subr.bf16.mxu0 %v2546_v31 }
 0x1ed   :  { %1263 = vmatpush1.bf16.msra.mxu1 %v2504_v35 }
 0x1ee   :  { %1264 = vmatprep.subr.bf16.mxu1 %v2509_v0  ;;  %2334 = vmatpush3.bf16.msra.mxu0 %v2547_v36  ;;  %v1617_v0 = vlaneseq }
 0x1ef   :  { %2335 = vmatprep.subr.bf16.mxu0 %v2548_v37 }
 0x1f1   :  { %1265 = vmatpush1.bf16.msra.mxu1 %v2507_v2  ;;  %v1618_v2 = vshrl.u32 %v1617_v0, 7 }
 0x1f2   :  { %1362 = vmatprep.subr.bf16.mxu1 %v2512_v1  ;;  %2336 = vmatpush3.bf16.msra.mxu0 %v2549_v38 }
 0x1f3   :  { %2337 = vmatprep.subr.bf16.mxu0 %v2550_v39 }
 0x1f4   :  { %2061 = vmatmul.mubr.msk.bf16.vlgmr.msra.gmra.mxu1 %vm1152_vm2, %v1078_v57 }
 0x1f5   :  { %1363 = vmatpush1.bf16.msra.mxu1 %v2510_v3  ;;  %1388 = vmatprep.mubr.bf16.mxu1 %v2586_v34 }
 0x1f6   :  { %1364 = vmatprep.subr.bf16.mxu1 %v2515_v4  ;;  %2338 = vmatpush3.bf16.msra.mxu0 %v2551_v40  ;;  %v2142_v40 = vld [vmem:[%s3482_s8] ss:$0 sm:$0xff] }
 0x1f7   :  { %2339 = vmatprep.subr.bf16.mxu0 %v2552_v41 }
 0x1f9   :  { %1365 = vmatpush1.bf16.msra.mxu1 %v2513_v5  ;;  %v1619_v5 = vsub.s32 0, %v1618_v2 }
 0x1fa   :  { %1366 = vmatprep.subr.bf16.mxu1 %v2518_v6  ;;  %2340 = vmatpush3.bf16.msra.mxu0 %v2553_v42  ;;  %v1615_v6 = vld [vmem:[%s3478_s4] sm:$0x3] }
 0x1fb   :  { %2341 = vmatprep.subr.bf16.mxu0 %v2554_v43 }
 0x1fd   :  { %1367 = vmatpush1.bf16.msra.mxu1 %v2516_v7 }
 0x1fe   :  { %1368 = vmatprep.subr.bf16.mxu1 %v2521_v8  ;;  %2342 = vmatpush3.bf16.msra.mxu0 %v2555_v44  ;;  %v1623_v8 = vsub.s32 1, %v1618_v2 }
 0x201   :  { %1369 = vmatpush1.bf16.msra.mxu1 %v2519_v9 }
 0x202   :  { %1370 = vmatprep.subr.bf16.mxu1 %v2524_v10  ;;  %v1620_v10 = vrot.slane %v1615_v6, %v1619_v5 }
 0x205   :  { %1371 = vmatpush1.bf16.msra.mxu1 %v2522_v11 }
 0x206   :  { %1578 = vmatprep.subr.bf16.mxu1 %v2527_v12 }
 0x208   :  { %2082 = vmatmul.mubr.msk.bf16.vlgmr.msra.gmra.mxu1 %vm1152_vm2, %v1302_v14  ;;  %v1624_v14 = vrot.slane %v1615_v6, %v1623_v8 }
 0x209   :  { %1579 = vmatpush1.bf16.msra.mxu1 %v2525_v13  ;;  %1604 = vmatprep.mubr.bf16.mxu1 %v2586_v34  ;;  %v2534_v34 = vld [vmem:[%s3477_s3 + $0x150] ss:$8 sps:$4 sm:$0xff]  }
 0x20a   :  { %1580 = vmatprep.subr.bf16.mxu1 %v2530_v15 }
 0x20d   :  { %1581 = vmatpush1.bf16.msra.mxu1 %v2528_v16 }
 0x20e   :  { %1582 = vmatprep.subr.bf16.mxu1 %v2533_v17 }
 0x211   :  { %1583 = vmatpush1.bf16.msra.mxu1 %v2531_v18 }
 0x212   :  { %1584 = vmatprep.subr.bf16.mxu1 %v2536_v19 }
 0x215   :  { %1585 = vmatpush1.bf16.msra.mxu1 %v2534_v34 }
 0x216   :  { %1586 = vmatprep.subr.bf16.mxu1 %v2539_v21 }
 0x219   :  { %1587 = vmatpush1.bf16.msra.mxu1 %v2537_v22 }
 0x21a   :  { %2358 = vmatprep.subr.bf16.mxu1 %v2587_v46 }
 0x21c   :  { %2124 = vmatmul.mubr.msk.bf16.vlgmr.msra.gmra.mxu1 %vm1152_vm2, %v1507_v24  ;;  %v2561_v24 = vld [vmem:[%s3481_s7 + $0x10] sm:$0xff]   ;;  %s2589_s7 = smov [#allocation2]  }
 0x21d   :  { %2359 = vmatpush3.bf16.msra.mxu1 %v2556_v45  ;;  %2374 = vmatprep.mubr.msk.bf16.mxu1 %vm2588_vm3, %v2587_v46  ;;  %s1928_s10 = sshll.u32 %s2589_s7, 4  ;;  %s1929_s10 = int_to_ptr.vmem [resolvable:$true] %s1928_s10 }
 0x21e   :  { %2360 = vmatprep.subr.bf16.mxu1 %v2587_v46  ;;  %s2564_s6 = scalar_lea.vmem %s1929_s10, 32  ;;  %p2569_p1 = scmp.lt.s32.totalorder %s1929_s10, %s1929_s10 }
 0x21f   :  { %p2565_p0 = scmp.ne.s32.totalorder %s1929_s10, %s2564_s6  ;;  %p2570_p2 = scmp.lt.s32.totalorder %s2564_s6, %s2564_s6 }
 0x221   :  { %2361 = vmatpush3.bf16.msra.mxu1 %v2557_v47  ;;  %p2571_p3 = por %p2570_p2, %p2569_p1 }
 0x222   :  { %2362 = vmatprep.subr.bf16.mxu1 %v2587_v46 }
 0x223   :  { %p2572_p4 = pnand %p2571_p3, %p2565_p0 }
 0x225   :  { %2363 = vmatpush3.bf16.msra.mxu1 %v2558_v48 }
 0x226   :  { %2364 = vmatprep.subr.bf16.mxu1 %v2587_v46 }
 0x229   :  { %2365 = vmatpush3.bf16.msra.mxu1 %v2559_v51 }
 0x22a   :  { %2366 = vmatprep.subr.bf16.mxu1 %v2587_v46 }
 0x22d   :  { %2367 = vmatpush3.bf16.msra.mxu1 %v2560_v49 }
 0x22e   :  { %2368 = vmatprep.subr.bf16.mxu1 %v2587_v46 }
 0x231   :  { %2369 = vmatpush3.bf16.msra.mxu1 %v2561_v24 }
 0x232   :  { %2370 = vmatprep.subr.bf16.mxu1 %v2587_v46 }
 0x235   :  { %2371 = vmatpush3.bf16.msra.mxu1 %v2562_v25 }
 0x236   :  { %2372 = vmatprep.subr.bf16.mxu1 %v2587_v46 }
 0x239   :  { %2373 = vmatpush3.bf16.msra.mxu1 %v2563_v26 }
 0x2a0   :  { %v1190_v50 = vpop.f32.mrf.mxu1  ;;  %v1498_v52 = vpop.f32.mrf.mxu0 }
 0x2a2   :  { %v1192_v53 = vpop.f32.mrf.mxu1  ;;  %v1500_v54 = vpop.f32.mrf.mxu0 }
 0x2a4   :  { %v1194_v55 = vpop.f32.mrf.mxu1  ;;  %v1502_v56 = vpop.f32.mrf.mxu0 }
 0x2a6   :  { %v1195_v57 = vpop.f32.mrf.mxu1  ;;  %v1503_v58 = vpop.f32.mrf.mxu0 }
 0x2b4   :  { %v1284_v59 = vpop.f32.mrf.mxu1 }
 0x2b5   :  { %v1285_v1 = vadd.f32 %v1284_v59, %v1190_v50 }
 0x2b6   :  { %v1286_v60 = vpop.f32.mrf.mxu1 }
 0x2b7   :  { %v1287_v3 = vadd.f32 %v1286_v60, %v1192_v53 }
 0x2b8   :  { %v1288_v61 = vpop.f32.mrf.mxu1 }
 0x2ba   :  { %v1289_v62 = vpop.f32.mrf.mxu1 }
 0x2c8   :  { %v1390_v63 = vpop.f32.mrf.mxu1 }
 0x2c9   :  { %v1397_v4 = vadd.f32 %v1390_v63, %v1285_v1 }
 0x2ca   :  { %v1392_v32 = vpop.f32.mrf.mxu1 }
 0x2cb   :  { %v1398_v7 = vadd.f32 %v1392_v32, %v1287_v3  ;;  %v1505_v9 = vadd.f32 %v1498_v52, %v1397_v4 }
 0x2cc   :  { %v1394_v33 = vpop.f32.mrf.mxu1 }
 0x2cd   :  { %v1506_v13 = vadd.f32 %v1500_v54, %v1398_v7 }
 0x2ce   :  { %v1395_v35 = vpop.f32.mrf.mxu1 }
 0x2dc   :  { %v1606_v11 = vpop.f32.mrf.mxu1 }
 0x2dd   :  { %v1613_v12 = vadd.f32 %v1606_v11, %v1505_v9 }
 0x2de   :  { %v1608_v15 = vpop.f32.mrf.mxu1 }
 0x2df   :  { %v1627_v16 = vadd.f32 %v1620_v10, %v1613_v12  ;;  %v1614_v17 = vadd.f32 %v1608_v15, %v1506_v13 }
 0x2e0   :  { %v1610_v18 = vpop.f32.mrf.mxu1 }
 0x2e1   :  { %v1628_v19 = vadd.f32 %v1624_v14, %v1614_v17  ;;  %v1629_v34 = vmax.f32 %v1627_v16, 0.0 }
 0x2e2   :  { %v1611_v20 = vpop.f32.mrf.mxu1 }
 0x2e3   :  { %v1630_v21 = vmax.f32 %v1628_v19, 0.0  ;;  %v1631_v23 = vpack.c.bf16 %v1629_v34, %v1629_v34 }
 0x2e5   :  { %v1632_v22 = vpack.c.bf16 %v1630_v21, %v1630_v21 }
 0x2e7   :  { %1800 = vmatprep.mubr.bf16.mxu0 %v1632_v22 }
 0x2e8   :  { %1801 = vmatmul.mubr.bf16.vlgmr.msra.gmra.mxu0 %v1631_v23 }
 0x3a8   :  { %v2343_v27 = vpop.f32.mrf.mxu0 }
 0x3aa   :  { %v2344_v29 = vpop.f32.mrf.mxu0 }
 0x3ab   :  { %v2345_v30 = vadd.f32 %v2344_v29, %v2343_v27 }
 0x3ac   :  { %v2346_v31 = vpop.f32.mrf.mxu0 }
 0x3ad   :  { %v1803_v36 = vadd.f32 %v2345_v30, %v2125_v28 }
 0x3ae   :  { %v2347_v37 = vpop.f32.mrf.mxu0 }
 0x3af   :  { %v1808_v38 = vmax.f32 %v1803_v36, 0.0 }
 0x3b1   :  { %v1809_v39 = vpack.c.bf16 %v1808_v38, %v1808_v38 }
 0x3b3   :  { %2375 = vmatmul.mubr.bf16.vlgmr.msra.gmra.mxu1 %v1809_v39 }
 0x473   :  { %v1915_v41 = vpop.f32.mrf.mxu1 }
 0x474   :  { %v1916_v42 = vadd.f32 %v2142_v40, %v1915_v41 }
 0x475   :  { %v2376_v43 = vpop.f32.mrf.mxu1 }
 0x476   :  { %1921 = vst [vmem:[#allocation2] sm:$0x3] %v1916_v42 }
 0x477   :  { %v1918_v44 = vpop.f32.mrf.mxu1 }
 0x478   :  { %2575 = shalt.err (!%p2572_p4)
}
 0x479   :  { %1931 = dma.vmem_to_hbm [thread:$0]  %s1929_s10, 32, %s3483_s9, [#allocation3]   ;;  %v2377_v45 = vpop.f32.mrf.mxu1 }
 0x47a   :  { %2584 = dma.done.wait [#allocation3], 32  }
 0x47b   :  { %2585 = vsyncadd [#allocation3], 4294967264 }
 0x47c   :  { %1935 = vsyncpa [#allocation3], 1 }

</bundles_post_ra>
